<compile_context>
chip_gen: v6e
topology: v6e:2x2x1
jax: 0.10.0
libtpu: 0.0.40
codegen_flags: <defaults>
</compile_context>

<pallas_src>
import functools
import numpy as np

import jax
import jax.numpy as jnp
from jax import lax
from jax.experimental import pallas as pl
from jax.experimental.pallas import tpu as pltpu


def _round_up(x, m):
    return ((x + m - 1) // m) * m


def _vmem_cap_bytes():
    """Physical VMEM per core (generation-aware); conservative fallback = v7x."""
    try:
        return int(pltpu.get_tpu_info().vmem_capacity_bytes)
    except Exception:
        return 64 << 20


def _vmem_limit(need_bytes, cap):
    """Scoped-VMEM request sized from the tiled footprint, capped below the
    physical capacity of the current generation."""
    lim = max(32 << 20, int(1.5 * need_bytes))
    return int(min(lim, int(cap * 0.75)))


# ----------------------------------------------------------------------------
# Pallas kernel 1: conv2d as ONE K-stacked MXU matmul on a row-flat image
#   - kw lane-shifted copies, kh aligned row slices each -> (T*Cin_p, Lp) in a
#     VMEM scratch, one dot against (Cout, T*Cin_p) bf16 weights, f32 acc.
#   - fused bias + optional residual add + LeakyReLU epilogue, bf16/f32 store.
# ----------------------------------------------------------------------------
def _conv_kernel(*refs, kh, kw, Wpad, Lp, Cin_p, alpha, with_res):
    if with_res:
        x_ref, w_ref, b_ref, r_ref, o_ref, xk_ref = refs
    else:
        x_ref, w_ref, b_ref, o_ref, xk_ref = refs
        r_ref = None
    span = Lp + (kh - 1) * Wpad
    # K-stack the taps: one unaligned lane shift per j, aligned row slices per i.
    for j in range(kw):
        xs = x_ref[0, :, j:j + span]                          # (Cin_p, span) bf16
        for i in range(kh):
            t = j * kh + i
            xk_ref[t * Cin_p:(t + 1) * Cin_p, :] = xs[:, i * Wpad:i * Wpad + Lp]
    acc = jnp.dot(w_ref[...], xk_ref[...],                     # (Cout, Lp) f32
                  preferred_element_type=jnp.float32)
    acc = acc + b_ref[...]                                     # bias (Cout, 1)
    if with_res:
        acc = acc + r_ref[0].astype(jnp.float32)               # fused residual
    if alpha is not None:
        acc = jnp.where(acc >= 0.0, acc, alpha * acc)          # fused LeakyReLU
    o_ref[0] = acc.astype(o_ref.dtype)


def conv2d_pallas(x, w, b, *, stride=1, padding=0, lrelu=None, residual=None,
                  out_dtype=jnp.bfloat16):
    """x: (B, Cin, H, W), w: (Cout, Cin, kh, kw), b: (Cout,). Zero padding.
    If `residual` (B, Cout, Ho, Wo) is given, it is added before the LeakyReLU
    (ResBlock tail fusion)."""
    B, Cin, H, W = x.shape
    Cout, _, kh, kw = w.shape
    Hp2, Wp2 = H + 2 * padding, W + 2 * padding
    Ho, Wo = Hp2 - kh + 1, Wp2 - kw + 1          # stride-1 extent; subsample later
    Cin_p = _round_up(max(Cin, 8), 8)             # sublane-aligned channel count
    Wpad = _round_up(Wp2, 128)                    # 128-aligned row pitch
    Lp = Ho * Wpad                                # lane-dense output width
    F = (Hp2 + 1) * Wpad                          # +1 zero row keeps taps in range
    K = kh * kw * Cin_p

    # Flatten image row-major with the padded pitch (+ extra zero row), bf16.
    xp = jnp.pad(x, ((0, 0), (0, 0), (padding, padding), (padding, padding)))
    xp = jnp.pad(xp, ((0, 0), (0, Cin_p - Cin), (0, 1), (0, Wpad - Wp2)))
    xf = xp.reshape(B, Cin_p, F).astype(jnp.bfloat16)

    # Weights -> (Cout, K) with K index = (j*kh + i)*Cin_p + c.
    wt = jnp.transpose(w, (3, 2, 1, 0))                        # (kw, kh, Cin, Cout)
    wt = jnp.pad(wt, ((0, 0), (0, 0), (0, Cin_p - Cin), (0, 0)))
    w2d = wt.reshape(K, Cout).T.astype(jnp.bfloat16)
    bias = b.reshape(Cout, 1).astype(jnp.float32)

    inputs = [xf, w2d, bias]
    in_specs = [
        pl.BlockSpec((1, Cin_p, F), lambda bi: (bi, 0, 0)),
        pl.BlockSpec((Cout, K), lambda bi: (0, 0)),
        pl.BlockSpec((Cout, 1), lambda bi: (0, 0)),
    ]
    if residual is not None:
        res = jnp.pad(residual.astype(jnp.bfloat16),
                      ((0, 0), (0, 0), (0, 0), (0, Wpad - Wo)))
        inputs.append(res.reshape(B, Cout, Lp))
        in_specs.append(pl.BlockSpec((1, Cout, Lp), lambda bi: (bi, 0, 0)))

    kernel = functools.partial(_conv_kernel, kh=kh, kw=kw, Wpad=Wpad, Lp=Lp,
                               Cin_p=Cin_p, alpha=lrelu,
                               with_res=residual is not None)

    obytes = jnp.dtype(out_dtype).itemsize
    span = Lp + (kh - 1) * Wpad
    cap = _vmem_cap_bytes()
    need = (2 * Cin_p * F * 2 + 2 * Cout * K * 2 + 2 * Cout * 4
            + (2 * Cout * Lp * 2 if residual is not None else 0)
            + 2 * Cout * Lp * obytes
            + K * Lp * 2                       # K-stack scratch
            + Cout * Lp * 4                    # f32 accumulator value
            + 2 * Cin_p * span * 2)            # shifted-copy temporaries

    out = pl.pallas_call(
        kernel,
        out_shape=jax.ShapeDtypeStruct((B, Cout, Lp), out_dtype),
        grid=(B,),
        in_specs=in_specs,
        out_specs=pl.BlockSpec((1, Cout, Lp), lambda bi: (bi, 0, 0)),
        scratch_shapes=[pltpu.VMEM((K, Lp), jnp.bfloat16)],
        compiler_params=pltpu.CompilerParams(
            dimension_semantics=("parallel",),
            vmem_limit_bytes=_vmem_limit(need, cap),
        ),
    )(*inputs)

    # drop the junk lane-padding columns per row, then apply stride.
    out = out.reshape(B, Cout, Ho, Wpad)[:, :, :, :Wo]
    if stride > 1:
        out = out[:, :, ::stride, ::stride]
    return out


# ----------------------------------------------------------------------------
# Pallas kernel 2: aligned bilinear sampling (gather-as-matmul, tiled over M)
#   - one-hot selection matrix built in bf16 via where-accumulation, f32 acc.
# ----------------------------------------------------------------------------
def _sample_kernel(px_ref, py_ref, x_ref, o_ref, *, Hp, Wp):
    px = px_ref[0]                                  # (1, TM) float32
    py = py_ref[0]
    fx = jnp.floor(px)
    fy = jnp.floor(py)
    qx_lt = jnp.clip(fx, 0.0, float(Hp - 1))
    qy_lt = jnp.clip(fy, 0.0, float(Wp - 1))
    qx_rb = jnp.clip(fx + 1.0, 0.0, float(Hp - 1))
    qy_rb = jnp.clip(fy + 1.0, 0.0, float(Wp - 1))
    pxc = jnp.clip(px, 0.0, float(Hp - 1))
    pyc = jnp.clip(py, 0.0, float(Wp - 1))

    wx_lt = 1.0 + (qx_lt - pxc)
    wx_rb = 1.0 - (qx_rb - pxc)
    wy_lt = 1.0 + (qy_lt - pyc)
    wy_rb = 1.0 - (qy_rb - pyc)
    g_lt = (wx_lt * wy_lt).astype(jnp.bfloat16)     # (1, TM) corner weights
    g_rb = (wx_rb * wy_rb).astype(jnp.bfloat16)
    g_lb = (wx_lt * wy_rb).astype(jnp.bfloat16)
    g_rt = (wx_rb * wy_lt).astype(jnp.bfloat16)

    i_lt = (qx_lt * Wp + qy_lt).astype(jnp.int32)
    i_rb = (qx_rb * Wp + qy_rb).astype(jnp.int32)
    i_lb = (qx_lt * Wp + qy_rb).astype(jnp.int32)
    i_rt = (qx_rb * Wp + qy_lt).astype(jnp.int32)

    P = Hp * Wp
    TM = px.shape[-1]
    rows = lax.broadcasted_iota(jnp.int32, (P, TM), 0)
    zero = jnp.zeros((), jnp.bfloat16)
    S = (jnp.where(rows == i_lt, g_lt, zero)
         + jnp.where(rows == i_rb, g_rb, zero)
         + jnp.where(rows == i_lb, g_lb, zero)
         + jnp.where(rows == i_rt, g_rt, zero))     # (P, TM) bf16

    # (C, P) @ (P, TM) bf16 -> f32: 4-corner gather + bilinear weighting on MXU.
    o_ref[0] = jnp.dot(x_ref[0], S, preferred_element_type=jnp.float32)


def aligned_sample_pallas(x_pad, px, py):
    """x_pad: (B, C, Hp, Wp); px, py: (B, h, w, N) sampling coords (rows, cols)."""
    B, C, Hp, Wp = x_pad.shape
    _, h, w, N = px.shape
    P = Hp * Wp
    M = h * w * N
    cap = _vmem_cap_bytes()
    TM = 512 if (cap >= (96 << 20) and M >= 512) else 256   # generation-aware tile
    Mp = _round_up(M, TM)

    x_flat = x_pad.reshape(B, C, P).astype(jnp.bfloat16)
    pxf = jnp.pad(px.reshape(B, 1, M).astype(jnp.float32),
                  ((0, 0), (0, 0), (0, Mp - M)))
    pyf = jnp.pad(py.reshape(B, 1, M).astype(jnp.float32),
                  ((0, 0), (0, 0), (0, Mp - M)))

    kernel = functools.partial(_sample_kernel, Hp=Hp, Wp=Wp)
    need = (2 * C * P * 2 + 4 * TM * 4 * 2 + 2 * C * TM * 4
            + P * TM * 4                      # int32 iota
            + 3 * P * TM * 2)                 # bf16 one-hot temporaries
    out = pl.pallas_call(
        kernel,
        out_shape=jax.ShapeDtypeStruct((B, C, Mp), jnp.float32),
        grid=(B, Mp // TM),
        in_specs=[
            pl.BlockSpec((1, 1, TM), lambda bi, mi: (bi, 0, mi)),
            pl.BlockSpec((1, 1, TM), lambda bi, mi: (bi, 0, mi)),
            pl.BlockSpec((1, C, P), lambda bi, mi: (bi, 0, 0)),
        ],
        out_specs=pl.BlockSpec((1, C, TM), lambda bi, mi: (bi, 0, mi)),
        compiler_params=pltpu.CompilerParams(
            dimension_semantics=("parallel", "parallel"),
            vmem_limit_bytes=_vmem_limit(need, cap),
        ),
    )(pxf, pyf, x_flat)
    return out[:, :, :M].reshape(B, C, h, w, N)


# ----------------------------------------------------------------------------
# Plain-JAX glue: bicubic x2 (PyTorch semantics), _get_p, reshape
# ----------------------------------------------------------------------------
_CUBIC_A = -0.75


def _cubic_weights(t):
    A = _CUBIC_A
    def c1(s):  # |s| <= 1
        return ((A + 2.0) * s - (A + 3.0)) * s * s + 1.0
    def c2(s):  # 1 < |s| < 2
        return ((A * s - 5.0 * A) * s + 8.0 * A) * s - 4.0 * A
    return jnp.stack([c2(t + 1.0), c1(t), c1(1.0 - t), c2(2.0 - t)], axis=-1)


def _upsample2x_axis(x, axis):
    n_in = x.shape[axis]
    n_out = 2 * n_in
    o = jnp.arange(n_out, dtype=jnp.float32)
    src = (o + 0.5) * 0.5 - 0.5          # align_corners=False, half-pixel
    i0 = jnp.floor(src)
    t = src - i0
    wts = _cubic_weights(t)                                    # (n_out, 4)
    idx = jnp.clip(i0[:, None].astype(jnp.int32) + jnp.arange(-1, 3)[None, :],
                   0, n_in - 1)                                # (n_out, 4) clamped
    g = jnp.take(x, idx, axis=axis)
    shp = [1] * g.ndim
    shp[axis] = n_out
    shp[axis + 1] = 4
    return jnp.sum(g * wts.reshape(shp), axis=axis + 1)


def bicubic_upsample_2x(x):
    x = _upsample2x_axis(x, 2)
    x = _upsample2x_axis(x, 3)
    return x


def get_p(affine, ks, stride):
    """affine: (B, 3, h, w) (already +1 and clamped). Returns px, py: (B,h,w,N)."""
    B, _, h, w = affine.shape
    N = ks * ks
    start = -1.0 * ((ks - 1) // 2) - 0.5
    offs = np.arange(start, (ks - 1) // 2 + 0.6, 1.0, dtype=np.float32)
    assert offs.size * offs.size == N, "kernel_size must be even for consistent _get_p_n"
    pnx = np.repeat(offs, offs.size)       # torch.meshgrid 'ij' -> flatten
    pny = np.tile(offs, offs.size)
    p0x = (1.0 + stride * np.arange(h, dtype=np.float32))     # rows
    p0y = (1.0 + stride * np.arange(w, dtype=np.float32))     # cols

    s_x = affine[:, 0, :, :][..., None]
    s_y = affine[:, 1, :, :][..., None]
    theta = (affine[:, 2, :, :][..., None] - 1.0) * 1.0472
    px = jnp.asarray(pnx)[None, None, None, :] * s_x
    py = jnp.asarray(pny)[None, None, None, :] * s_y
    c, s = jnp.cos(theta), jnp.sin(theta)
    rx = px * c - py * s                   # p @ [[c, s], [-s, c]]
    ry = px * s + py * c
    off0 = float((ks - 1) // 2) + 0.5
    px_f = rx + off0 + jnp.asarray(p0x)[None, :, None, None]
    py_f = ry + off0 + jnp.asarray(p0y)[None, None, :, None]
    return px_f, py_f


def reshape_alignment(al, ks):
    b, c, h, w, N = al.shape
    chunks = [al[..., s:s + ks].reshape(b, c, h, w * ks) for s in range(0, N, ks)]
    al = jnp.concatenate(chunks, axis=-1)
    return al.reshape(b, c, h * ks, w * ks)


# ----------------------------------------------------------------------------
# Module forward (conv1 / p_conv stacks + aligned sampling)
# ----------------------------------------------------------------------------
def conv1_block(p, x):
    y = conv2d_pallas(x, p["c1_w"], p["c1_b"], padding=2, lrelu=0.2)
    r = conv2d_pallas(y, p["ra1_w"], p["ra1_b"], padding=1, lrelu=0.2)
    # ResBlock tail: conv + residual add + trailing LeakyReLU fused in-kernel.
    return conv2d_pallas(r, p["ra2_w"], p["ra2_b"], padding=1,
                         residual=y, lrelu=0.2)


def p_conv_block(p, x, stride):
    y = conv2d_pallas(x, p["p1_w"], p["p1_b"], padding=2, stride=stride, lrelu=0.2)
    r = conv2d_pallas(y, p["rb1_w"], p["rb1_b"], padding=1, lrelu=0.2)
    y = conv2d_pallas(r, p["rb2_w"], p["rb2_b"], padding=1,
                      residual=y, lrelu=0.2)
    return conv2d_pallas(y, p["p2_w"], p["p2_b"], padding=0,
                         out_dtype=jnp.float32)


def aligned_conv2d_forward(params, x, query, ref, *, ks=2, padding=1, stride=1):
    query = bicubic_upsample_2x(query)
    fr = conv1_block(params, ref)
    fq = conv1_block(params, query)
    affine = p_conv_block(params, jnp.concatenate([fr, fq], axis=1), stride) + 1.0
    affine = jnp.clip(affine, -3.0, 3.0)
    if padding:
        x = jnp.pad(x, ((0, 0), (0, 0), (padding, padding), (padding, padding)),
                    mode="reflect")
    px, py = get_p(affine, ks, stride)                    # (B,h,w,N) each
    alignment = aligned_sample_pallas(x, px, py)          # (B,C,h,w,N)
    return reshape_alignment(alignment, ks)               # (B,C,h*ks,w*ks)


def init_params(key):
    def conv_init(k, cout, cin, kh, kw):
        kw_, kb = jax.random.split(k)
        fan_in = cin * kh * kw
        w = jax.random.normal(kw_, (cout, cin, kh, kw), jnp.float32) / np.sqrt(fan_in)
        b = 0.01 * jax.random.normal(kb, (cout,), jnp.float32)
        return w, b

    keys = jax.random.split(key, 7)
    p = {}
    p["c1_w"], p["c1_b"] = conv_init(keys[0], 32, 3, 5, 5)      # conv1 head 5x5
    p["ra1_w"], p["ra1_b"] = conv_init(keys[1], 32, 32, 3, 3)   # conv1 ResBlock
    p["ra2_w"], p["ra2_b"] = conv_init(keys[2], 32, 32, 3, 3)
    p["p1_w"], p["p1_b"] = conv_init(keys[3], 32, 64, 5, 5)     # p_conv head 5x5
    p["rb1_w"], p["rb1_b"] = conv_init(keys[4], 32, 32, 3, 3)   # p_conv ResBlock
    p["rb2_w"], p["rb2_b"] = conv_init(keys[5], 32, 32, 3, 3)
    p["p2_w"], p["p2_b"] = conv_init(keys[6], 3, 32, 1, 1)      # p_conv 1x1 -> 3
    return p


if __name__ == "__main__":
    key = jax.random.PRNGKey(0)
    k_p, k_x, k_q, k_r = jax.random.split(key, 4)

    B, inc, H, W = 2, 4, 16, 16
    ks = 2  # see note at top: default ks=3 is inconsistent in the PyTorch source

    params = init_params(k_p)
    x = jax.random.normal(k_x, (B, inc, H, W), jnp.float32)
    query = jax.random.normal(k_q, (B, 3, H // 2, W // 2), jnp.float32)
    ref = jax.random.normal(k_r, (B, 3, H, W), jnp.float32)

    out = aligned_conv2d_forward(params, x, query, ref, ks=ks, padding=1, stride=1)
    out = jax.block_until_ready(out)

    assert out.shape == (B, inc, H * ks, W * ks), out.shape
    assert bool(jnp.all(jnp.isfinite(out)))
    print("KERNEL_OK")
</pallas_src>

<mosaic_0001>
module attributes {stable_mosaic.version = 11 : i64} {
  func.func @_conv_kernel(%arg0: i32, %arg1: memref<1x8x2688xbf16, #tpu.memory_space<vmem>>, %arg2: memref<32x200xbf16, #tpu.memory_space<vmem>>, %arg3: memref<32x1xf32, #tpu.memory_space<vmem>>, %arg4: memref<1x32x2048xbf16, #tpu.memory_space<vmem>>, %arg5: memref<200x2048xbf16, #tpu.memory_space<vmem>>) attributes {dimension_semantics = [#tpu.dimension_semantics<parallel>], iteration_bounds = array<i64: 2>, scalar_prefetch = 0 : i64, scratch_operands = 1 : i64, tpu.core_type = #tpu.core_type<tc>, window_params = [{transform_indices = @transform_0, window_bounds = array<i64: 1, 8, 2688>}, {pipeline_mode = #tpu.pipeline_mode<synchronous>, transform_indices = @transform_1, window_bounds = array<i64: 32, 200>}, {pipeline_mode = #tpu.pipeline_mode<synchronous>, transform_indices = @transform_2, window_bounds = array<i64: 32, 1>}, {transform_indices = @transform_3, window_bounds = array<i64: 1, 32, 2048>}]} {
    %c0 = arith.constant 0 : index
    %c0_0 = arith.constant 0 : index
    %c0_1 = arith.constant 0 : index
    %0 = vector.load %arg1[%c0, %c0_0, %c0_1] : memref<1x8x2688xbf16, #tpu.memory_space<vmem>>, vector<1x8x2560xbf16>
    %1 = vector.shape_cast %0 : vector<1x8x2560xbf16> to vector<8x2560xbf16>
    %2 = vector.extract_strided_slice %1 {offsets = [0, 0], sizes = [8, 2048], strides = [1, 1]} : vector<8x2560xbf16> to vector<8x2048xbf16>
    %c0_2 = arith.constant 0 : index
    %c0_3 = arith.constant 0 : index
    %3 = vector.load %arg5[%c0_2, %c0_3] : memref<200x2048xbf16, #tpu.memory_space<vmem>>, vector<8x2048xbf16>
    tpu.vector_store %arg5[%c0_2, %c0_3], %2 {strides = array<i32>} : memref<200x2048xbf16, #tpu.memory_space<vmem>>, vector<8x2048xbf16>,
    %4 = vector.extract_strided_slice %1 {offsets = [0, 128], sizes = [8, 2048], strides = [1, 1]} : vector<8x2560xbf16> to vector<8x2048xbf16>
    %c8 = arith.constant 8 : index
    %c0_4 = arith.constant 0 : index
    %5 = vector.load %arg5[%c8, %c0_4] : memref<200x2048xbf16, #tpu.memory_space<vmem>>, vector<8x2048xbf16>
    tpu.vector_store %arg5[%c8, %c0_4], %4 {strides = array<i32>} : memref<200x2048xbf16, #tpu.memory_space<vmem>>, vector<8x2048xbf16>,
    %6 = vector.extract_strided_slice %1 {offsets = [0, 256], sizes = [8, 2048], strides = [1, 1]} : vector<8x2560xbf16> to vector<8x2048xbf16>
    %c16 = arith.constant 16 : index
    %c0_5 = arith.constant 0 : index
    %7 = vector.load %arg5[%c16, %c0_5] : memref<200x2048xbf16, #tpu.memory_space<vmem>>, vector<8x2048xbf16>
    tpu.vector_store %arg5[%c16, %c0_5], %6 {strides = array<i32>} : memref<200x2048xbf16, #tpu.memory_space<vmem>>, vector<8x2048xbf16>,
    %8 = vector.extract_strided_slice %1 {offsets = [0, 384], sizes = [8, 2048], strides = [1, 1]} : vector<8x2560xbf16> to vector<8x2048xbf16>
    %c24 = arith.constant 24 : index
    %c0_6 = arith.constant 0 : index
    %9 = vector.load %arg5[%c24, %c0_6] : memref<200x2048xbf16, #tpu.memory_space<vmem>>, vector<8x2048xbf16>
    tpu.vector_store %arg5[%c24, %c0_6], %8 {strides = array<i32>} : memref<200x2048xbf16, #tpu.memory_space<vmem>>, vector<8x2048xbf16>,
    %10 = vector.extract_strided_slice %1 {offsets = [0, 512], sizes = [8, 2048], strides = [1, 1]} : vector<8x2560xbf16> to vector<8x2048xbf16>
    %c32 = arith.constant 32 : index
    %c0_7 = arith.constant 0 : index
    %11 = vector.load %arg5[%c32, %c0_7] : memref<200x2048xbf16, #tpu.memory_space<vmem>>, vector<8x2048xbf16>
    tpu.vector_store %arg5[%c32, %c0_7], %10 {strides = array<i32>} : memref<200x2048xbf16, #tpu.memory_space<vmem>>, vector<8x2048xbf16>,
    %c0_8 = arith.constant 0 : index
    %c0_9 = arith.constant 0 : index
    %c1 = arith.constant 1 : index
    %12 = vector.load %arg1[%c0_8, %c0_9, %c1] : memref<1x8x2688xbf16, #tpu.memory_space<vmem>>, vector<1x8x2560xbf16>
    %13 = vector.shape_cast %12 : vector<1x8x2560xbf16> to vector<8x2560xbf16>
    %14 = vector.extract_strided_slice %13 {offsets = [0, 0], sizes = [8, 2048], strides = [1, 1]} : vector<8x2560xbf16> to vector<8x2048xbf16>
    %c40 = arith.constant 40 : index
    %c0_10 = arith.constant 0 : index
    %15 = vector.load %arg5[%c40, %c0_10] : memref<200x2048xbf16, #tpu.memory_space<vmem>>, vector<8x2048xbf16>
    tpu.vector_store %arg5[%c40, %c0_10], %14 {strides = array<i32>} : memref<200x2048xbf16, #tpu.memory_space<vmem>>, vector<8x2048xbf16>,
    %16 = vector.extract_strided_slice %13 {offsets = [0, 128], sizes = [8, 2048], strides = [1, 1]} : vector<8x2560xbf16> to vector<8x2048xbf16>
    %c48 = arith.constant 48 : index
    %c0_11 = arith.constant 0 : index
    %17 = vector.load %arg5[%c48, %c0_11] : memref<200x2048xbf16, #tpu.memory_space<vmem>>, vector<8x2048xbf16>
    tpu.vector_store %arg5[%c48, %c0_11], %16 {strides = array<i32>} : memref<200x2048xbf16, #tpu.memory_space<vmem>>, vector<8x2048xbf16>,
    %18 = vector.extract_strided_slice %13 {offsets = [0, 256], sizes = [8, 2048], strides = [1, 1]} : vector<8x2560xbf16> to vector<8x2048xbf16>
    %c56 = arith.constant 56 : index
    %c0_12 = arith.constant 0 : index
    %19 = vector.load %arg5[%c56, %c0_12] : memref<200x2048xbf16, #tpu.memory_space<vmem>>, vector<8x2048xbf16>
    tpu.vector_store %arg5[%c56, %c0_12], %18 {strides = array<i32>} : memref<200x2048xbf16, #tpu.memory_space<vmem>>, vector<8x2048xbf16>,
    %20 = vector.extract_strided_slice %13 {offsets = [0, 384], sizes = [8, 2048], strides = [1, 1]} : vector<8x2560xbf16> to vector<8x2048xbf16>
    %c64 = arith.constant 64 : index
    %c0_13 = arith.constant 0 : index
    %21 = vector.load %arg5[%c64, %c0_13] : memref<200x2048xbf16, #tpu.memory_space<vmem>>, vector<8x2048xbf16>
    tpu.vector_store %arg5[%c64, %c0_13], %20 {strides = array<i32>} : memref<200x2048xbf16, #tpu.memory_space<vmem>>, vector<8x2048xbf16>,
    %22 = vector.extract_strided_slice %13 {offsets = [0, 512], sizes = [8, 2048], strides = [1, 1]} : vector<8x2560xbf16> to vector<8x2048xbf16>
    %c72 = arith.constant 72 : index
    %c0_14 = arith.constant 0 : index
    %23 = vector.load %arg5[%c72, %c0_14] : memref<200x2048xbf16, #tpu.memory_space<vmem>>, vector<8x2048xbf16>
    tpu.vector_store %arg5[%c72, %c0_14], %22 {strides = array<i32>} : memref<200x2048xbf16, #tpu.memory_space<vmem>>, vector<8x2048xbf16>,
    %c0_15 = arith.constant 0 : index
    %c0_16 = arith.constant 0 : index
    %c2 = arith.constant 2 : index
    %24 = vector.load %arg1[%c0_15, %c0_16, %c2] : memref<1x8x2688xbf16, #tpu.memory_space<vmem>>, vector<1x8x2560xbf16>
    %25 = vector.shape_cast %24 : vector<1x8x2560xbf16> to vector<8x2560xbf16>
    %26 = vector.extract_strided_slice %25 {offsets = [0, 0], sizes = [8, 2048], strides = [1, 1]} : vector<8x2560xbf16> to vector<8x2048xbf16>
    %c80 = arith.constant 80 : index
    %c0_17 = arith.constant 0 : index
    %27 = vector.load %arg5[%c80, %c0_17] : memref<200x2048xbf16, #tpu.memory_space<vmem>>, vector<8x2048xbf16>
    tpu.vector_store %arg5[%c80, %c0_17], %26 {strides = array<i32>} : memref<200x2048xbf16, #tpu.memory_space<vmem>>, vector<8x2048xbf16>,
    %28 = vector.extract_strided_slice %25 {offsets = [0, 128], sizes = [8, 2048], strides = [1, 1]} : vector<8x2560xbf16> to vector<8x2048xbf16>
    %c88 = arith.constant 88 : index
    %c0_18 = arith.constant 0 : index
    %29 = vector.load %arg5[%c88, %c0_18] : memref<200x2048xbf16, #tpu.memory_space<vmem>>, vector<8x2048xbf16>
    tpu.vector_store %arg5[%c88, %c0_18], %28 {strides = array<i32>} : memref<200x2048xbf16, #tpu.memory_space<vmem>>, vector<8x2048xbf16>,
    %30 = vector.extract_strided_slice %25 {offsets = [0, 256], sizes = [8, 2048], strides = [1, 1]} : vector<8x2560xbf16> to vector<8x2048xbf16>
    %c96 = arith.constant 96 : index
    %c0_19 = arith.constant 0 : index
    %31 = vector.load %arg5[%c96, %c0_19] : memref<200x2048xbf16, #tpu.memory_space<vmem>>, vector<8x2048xbf16>
    tpu.vector_store %arg5[%c96, %c0_19], %30 {strides = array<i32>} : memref<200x2048xbf16, #tpu.memory_space<vmem>>, vector<8x2048xbf16>,
    %32 = vector.extract_strided_slice %25 {offsets = [0, 384], sizes = [8, 2048], strides = [1, 1]} : vector<8x2560xbf16> to vector<8x2048xbf16>
    %c104 = arith.constant 104 : index
    %c0_20 = arith.constant 0 : index
    %33 = vector.load %arg5[%c104, %c0_20] : memref<200x2048xbf16, #tpu.memory_space<vmem>>, vector<8x2048xbf16>
    tpu.vector_store %arg5[%c104, %c0_20], %32 {strides = array<i32>} : memref<200x2048xbf16, #tpu.memory_space<vmem>>, vector<8x2048xbf16>,
    %34 = vector.extract_strided_slice %25 {offsets = [0, 512], sizes = [8, 2048], strides = [1, 1]} : vector<8x2560xbf16> to vector<8x2048xbf16>
    %c112 = arith.constant 112 : index
    %c0_21 = arith.constant 0 : index
    %35 = vector.load %arg5[%c112, %c0_21] : memref<200x2048xbf16, #tpu.memory_space<vmem>>, vector<8x2048xbf16>
    tpu.vector_store %arg5[%c112, %c0_21], %34 {strides = array<i32>} : memref<200x2048xbf16, #tpu.memory_space<vmem>>, vector<8x2048xbf16>,
    %c0_22 = arith.constant 0 : index
    %c0_23 = arith.constant 0 : index
    %c3 = arith.constant 3 : index
    %36 = vector.load %arg1[%c0_22, %c0_23, %c3] : memref<1x8x2688xbf16, #tpu.memory_space<vmem>>, vector<1x8x2560xbf16>
    %37 = vector.shape_cast %36 : vector<1x8x2560xbf16> to vector<8x2560xbf16>
    %38 = vector.extract_strided_slice %37 {offsets = [0, 0], sizes = [8, 2048], strides = [1, 1]} : vector<8x2560xbf16> to vector<8x2048xbf16>
    %c120 = arith.constant 120 : index
    %c0_24 = arith.constant 0 : index
    %39 = vector.load %arg5[%c120, %c0_24] : memref<200x2048xbf16, #tpu.memory_space<vmem>>, vector<8x2048xbf16>
    tpu.vector_store %arg5[%c120, %c0_24], %38 {strides = array<i32>} : memref<200x2048xbf16, #tpu.memory_space<vmem>>, vector<8x2048xbf16>,
    %40 = vector.extract_strided_slice %37 {offsets = [0, 128], sizes = [8, 2048], strides = [1, 1]} : vector<8x2560xbf16> to vector<8x2048xbf16>
    %c128 = arith.constant 128 : index
    %c0_25 = arith.constant 0 : index
    %41 = vector.load %arg5[%c128, %c0_25] : memref<200x2048xbf16, #tpu.memory_space<vmem>>, vector<8x2048xbf16>
    tpu.vector_store %arg5[%c128, %c0_25], %40 {strides = array<i32>} : memref<200x2048xbf16, #tpu.memory_space<vmem>>, vector<8x2048xbf16>,
    %42 = vector.extract_strided_slice %37 {offsets = [0, 256], sizes = [8, 2048], strides = [1, 1]} : vector<8x2560xbf16> to vector<8x2048xbf16>
    %c136 = arith.constant 136 : index
    %c0_26 = arith.constant 0 : index
    %43 = vector.load %arg5[%c136, %c0_26] : memref<200x2048xbf16, #tpu.memory_space<vmem>>, vector<8x2048xbf16>
    tpu.vector_store %arg5[%c136, %c0_26], %42 {strides = array<i32>} : memref<200x2048xbf16, #tpu.memory_space<vmem>>, vector<8x2048xbf16>,
    %44 = vector.extract_strided_slice %37 {offsets = [0, 384], sizes = [8, 2048], strides = [1, 1]} : vector<8x2560xbf16> to vector<8x2048xbf16>
    %c144 = arith.constant 144 : index
    %c0_27 = arith.constant 0 : index
    %45 = vector.load %arg5[%c144, %c0_27] : memref<200x2048xbf16, #tpu.memory_space<vmem>>, vector<8x2048xbf16>
    tpu.vector_store %arg5[%c144, %c0_27], %44 {strides = array<i32>} : memref<200x2048xbf16, #tpu.memory_space<vmem>>, vector<8x2048xbf16>,
    %46 = vector.extract_strided_slice %37 {offsets = [0, 512], sizes = [8, 2048], strides = [1, 1]} : vector<8x2560xbf16> to vector<8x2048xbf16>
    %c152 = arith.constant 152 : index
    %c0_28 = arith.constant 0 : index
    %47 = vector.load %arg5[%c152, %c0_28] : memref<200x2048xbf16, #tpu.memory_space<vmem>>, vector<8x2048xbf16>
    tpu.vector_store %arg5[%c152, %c0_28], %46 {strides = array<i32>} : memref<200x2048xbf16, #tpu.memory_space<vmem>>, vector<8x2048xbf16>,
    %c0_29 = arith.constant 0 : index
    %c0_30 = arith.constant 0 : index
    %c4 = arith.constant 4 : index
    %48 = vector.load %arg1[%c0_29, %c0_30, %c4] : memref<1x8x2688xbf16, #tpu.memory_space<vmem>>, vector<1x8x2560xbf16>
    %49 = vector.shape_cast %48 : vector<1x8x2560xbf16> to vector<8x2560xbf16>
    %50 = vector.extract_strided_slice %49 {offsets = [0, 0], sizes = [8, 2048], strides = [1, 1]} : vector<8x2560xbf16> to vector<8x2048xbf16>
    %c160 = arith.constant 160 : index
    %c0_31 = arith.constant 0 : index
    %51 = vector.load %arg5[%c160, %c0_31] : memref<200x2048xbf16, #tpu.memory_space<vmem>>, vector<8x2048xbf16>
    tpu.vector_store %arg5[%c160, %c0_31], %50 {strides = array<i32>} : memref<200x2048xbf16, #tpu.memory_space<vmem>>, vector<8x2048xbf16>,
    %52 = vector.extract_strided_slice %49 {offsets = [0, 128], sizes = [8, 2048], strides = [1, 1]} : vector<8x2560xbf16> to vector<8x2048xbf16>
    %c168 = arith.constant 168 : index
    %c0_32 = arith.constant 0 : index
    %53 = vector.load %arg5[%c168, %c0_32] : memref<200x2048xbf16, #tpu.memory_space<vmem>>, vector<8x2048xbf16>
    tpu.vector_store %arg5[%c168, %c0_32], %52 {strides = array<i32>} : memref<200x2048xbf16, #tpu.memory_space<vmem>>, vector<8x2048xbf16>,
    %54 = vector.extract_strided_slice %49 {offsets = [0, 256], sizes = [8, 2048], strides = [1, 1]} : vector<8x2560xbf16> to vector<8x2048xbf16>
    %c176 = arith.constant 176 : index
    %c0_33 = arith.constant 0 : index
    %55 = vector.load %arg5[%c176, %c0_33] : memref<200x2048xbf16, #tpu.memory_space<vmem>>, vector<8x2048xbf16>
    tpu.vector_store %arg5[%c176, %c0_33], %54 {strides = array<i32>} : memref<200x2048xbf16, #tpu.memory_space<vmem>>, vector<8x2048xbf16>,
    %56 = vector.extract_strided_slice %49 {offsets = [0, 384], sizes = [8, 2048], strides = [1, 1]} : vector<8x2560xbf16> to vector<8x2048xbf16>
    %c184 = arith.constant 184 : index
    %c0_34 = arith.constant 0 : index
    %57 = vector.load %arg5[%c184, %c0_34] : memref<200x2048xbf16, #tpu.memory_space<vmem>>, vector<8x2048xbf16>
    tpu.vector_store %arg5[%c184, %c0_34], %56 {strides = array<i32>} : memref<200x2048xbf16, #tpu.memory_space<vmem>>, vector<8x2048xbf16>,
    %58 = vector.extract_strided_slice %49 {offsets = [0, 512], sizes = [8, 2048], strides = [1, 1]} : vector<8x2560xbf16> to vector<8x2048xbf16>
    %c192 = arith.constant 192 : index
    %c0_35 = arith.constant 0 : index
    %59 = vector.load %arg5[%c192, %c0_35] : memref<200x2048xbf16, #tpu.memory_space<vmem>>, vector<8x2048xbf16>
    tpu.vector_store %arg5[%c192, %c0_35], %58 {strides = array<i32>} : memref<200x2048xbf16, #tpu.memory_space<vmem>>, vector<8x2048xbf16>,
    %c0_36 = arith.constant 0 : index
    %c0_37 = arith.constant 0 : index
    %60 = vector.load %arg2[%c0_36, %c0_37] : memref<32x200xbf16, #tpu.memory_space<vmem>>, vector<32x200xbf16>
    %c0_38 = arith.constant 0 : index
    %c0_39 = arith.constant 0 : index
    %61 = vector.load %arg5[%c0_38, %c0_39] : memref<200x2048xbf16, #tpu.memory_space<vmem>>, vector<200x2048xbf16>
    %cst = arith.constant dense<0.000000e+00> : vector<32x2048xf32>
    %62 = tpu.matmul %60, %61, %cst {dimension_numbers = #tpu.dot_dimension_numbers<[1], [0], [0], [1], [0, 0, 1, 1], [], []>} : vector<32x200xbf16>, vector<200x2048xbf16>, vector<32x2048xf32> -> vector<32x2048xf32>
    %c0_40 = arith.constant 0 : index
    %c0_41 = arith.constant 0 : index
    %63 = vector.load %arg3[%c0_40, %c0_41] : memref<32x1xf32, #tpu.memory_space<vmem>>, vector<32x1xf32>
    %64 = vector.broadcast %63 : vector<32x1xf32> to vector<32x2048xf32>
    %65 = arith.addf %62, %64 : vector<32x2048xf32>
    %cst_42 = arith.constant 0.000000e+00 : f32
    %66 = vector.broadcast %cst_42 : f32 to vector<32x2048xf32>
    %67 = arith.cmpf oge, %65, %66 : vector<32x2048xf32>
    %cst_43 = arith.constant 2.000000e-01 : f32
    %68 = vector.broadcast %cst_43 : f32 to vector<32x2048xf32>
    %69 = arith.mulf %68, %65 : vector<32x2048xf32>
    %70 = arith.select %67, %65, %69 : vector<32x2048xi1>, vector<32x2048xf32>
    %71 = arith.truncf %70 : vector<32x2048xf32> to vector<32x2048xbf16>
    %c0_44 = arith.constant 0 : index
    %c0_45 = arith.constant 0 : index
    %c0_46 = arith.constant 0 : index
    %72 = vector.load %arg4[%c0_44, %c0_45, %c0_46] : memref<1x32x2048xbf16, #tpu.memory_space<vmem>>, vector<1x32x2048xbf16>
    %73 = vector.shape_cast %72 : vector<1x32x2048xbf16> to vector<32x2048xbf16>
    %74 = vector.shape_cast %71 : vector<32x2048xbf16> to vector<1x32x2048xbf16>
    tpu.vector_store %arg4[%c0_44, %c0_45, %c0_46], %74 {strides = array<i32>} : memref<1x32x2048xbf16, #tpu.memory_space<vmem>>, vector<1x32x2048xbf16>,
    return
  }
  func.func @transform_0(%arg0: i32) -> (i32, i32, i32) {
    %c0_i32 = arith.constant 0 : i32
    %c0_i32_0 = arith.constant 0 : i32
    %c0_i32_1 = arith.constant 0 : i32
    return %arg0, %c0_i32, %c0_i32_0 : i32, i32, i32
  }
  func.func @transform_1(%arg0: i32) -> (i32, i32) {
    %c0_i32 = arith.constant 0 : i32
    %c0_i32_0 = arith.constant 0 : i32
    %c0_i32_1 = arith.constant 0 : i32
    return %c0_i32, %c0_i32_0 : i32, i32
  }
  func.func @transform_2(%arg0: i32) -> (i32, i32) {
    %c0_i32 = arith.constant 0 : i32
    %c0_i32_0 = arith.constant 0 : i32
    %c0_i32_1 = arith.constant 0 : i32
    return %c0_i32, %c0_i32_0 : i32, i32
  }
  func.func @transform_3(%arg0: i32) -> (i32, i32, i32) {
    %c0_i32 = arith.constant 0 : i32
    %c0_i32_0 = arith.constant 0 : i32
    %c0_i32_1 = arith.constant 0 : i32
    return %arg0, %c0_i32, %c0_i32_0 : i32, i32, i32
  }
}

</mosaic_0001>

<bundles_post_ra>
// kernel: tpu_custom_call.1
= control target key start
LH: loop header
LB: loop body
LE: loop exit
PB: predicated region body
PF: predicated region fallthrough
CT: control target
= control target key end

     0   :  { %8 = vsyncpa [#allocation4], 0  ;;  %s4618_s0 = inlined_call_operand.hbm [shape: bf16[2,8,2688], index: 0, kind: input, shape index: {}]   ;;  %s4619_s1 = inlined_call_operand.vmem [shape: bf16[32,200], index: 1, kind: input, shape index: {}]   ;;  %s4620_s2 = inlined_call_operand.vmem [shape: f32[32,1], index: 2, kind: input, shape index: {}]   ;;  %s4621_s3 = inlined_call_operand.hbm [shape: bf16[2,32,2048], index: 3, kind: output, shape index: {}]  }
   0x1   :  { %10 = vsyncpa [#allocation4 + $0x1], 0 }
   0x2   :  { %11 = vsyncpa [#allocation5], 0 }
   0x3   :  { %13 = vsyncpa [#allocation5 + $0x1], 0  ;;  %s3583_s12 = smov 0   ;;  %s3585_s13 = smov 0  }
   0x4   :  { %s3587_s14 = smov 0   ;;  %s3589_s15 = smov 0  }
   0x5 LB: > { %s3604_s16 = sadd.s32 4294967295, %s3552_s15   ;;  %s3082_s17 = sadd.s32 4294967294, %s3552_s15   ;;  %s3552_s15 = sphi %s3589_s15, %s4637_s15   ;;  %s3548_s14 = sphi %s3587_s14, %s4636_s14   ;;  %s3544_s13 = sphi %s3585_s13, %s4635_s13   ;;  %s3540_s12 = sphi %s3583_s12, %s4634_s12  }
   0x6   : > { %s3608_s18 = sadd.s32 1, %s3552_s15   ;;  %s26_s19 = sadd.s32 1, %s3548_s14 }
   0x7   : > { %s23_s20 = ssub.s32 %s3552_s15, %s3608_s18  ;;  %p33_p0 = scmp.ne.s32.totalorder %s3548_s14, %s3544_s13 }
   0x8   : > { %p24_p1 = scmp.eq.s32.totalorder %s23_s20, 0  ;;  %p34_p2 = scmp.eq.s32.totalorder %s3552_s15, 0 }
   0x9   : > { %p39_p3 = scmp.ne.s32.totalorder %s3544_s13, %s3540_s12  ;;  %p40_p4 = scmp.eq.s32.totalorder %s3604_s16, 0 }
   0xa   : > { %s3620_s21 = scalar_select %p24_p1, %s3548_s14, %s26_s19  }
   0xb   : > { %p35_p5 = por %p34_p2, %p33_p0  ;;  %p3622_p6 = por %p40_p4, %p39_p3 }
   0xc   : > { %p105_p7 = scmp.eq.s32.totalorder %s3604_s16, 1  ;;  %p111_p8 = scmp.eq.s32.totalorder %s3082_s17, 1 }
   0xd   : > { %s4624_s22 = scalar_select %p3622_p6, 1, 0 }
   0xe   : > { %p3409_p10 = scmp.lt.s32.totalorder %s3552_s15, 2  ;;  %p3629_p11 = por %p105_p7, %p33_p0 }
   0xf   : > { %p3633_p12 = por %p111_p8, %p39_p3  ;;  %s137_s25 = sand.u32 1, %s3548_s14  }
  0x10   : > { %s4625_s23 = scalar_select %p3629_p11, 1, 0 }
  0x11   : > { %s4626_s24 = scalar_select %p3633_p12, 1, 0 }
  0x12   : > { %s3395_s26 = smul.u32 1344, %s3552_s15  ;;  %p3644_p13 = pnand %p3409_p10, %p35_p5 }
  0x13   : > { %s3394_s27 = smul.u32 84, %s137_s25  ;;  %s138_s7 = scalar_lea.sflag [#allocation4], %s137_s25 }
  0x14   : > { %s3642_s30 = scalar_lea.hbm %s4618_s0, %s3395_s26  ;;  %p3462_p3 = pneg %p3644_p13 }
  0x15   : > { %s141_s5 = scalar_lea.vmem [#allocation3], %s3394_s27  ;;  %s3460_s8 = scalar_lea.hbm %s3642_s30, 1344 }
  0x16   : > { %s149_s6 = sshll.u32 %s141_s5, 4  ;;  %p3461_p2 = scmp.ne.s32.totalorder %s3642_s30, %s3460_s8  ;;  %s150_s6 = int_to_ptr.vmem [resolvable:$true] %s149_s6 }
  0x17   : > { %s3465_s11 = scalar_lea.hbm %s4618_s0, 2688  ;;  %p3466_p5 = scmp.lt.s32.totalorder %s3642_s30, %s4618_s0 }
  0x18   : > { %p3463_p4 = pnand %p3462_p3, %p3461_p2  ;;  %p3467_p8 = scmp.lt.s32.totalorder %s3465_s11, %s3460_s8 }
  0x1a   : > { %p3464_p7 = pneg %p3463_p4  ;;  %p3468_p10 = por %p3467_p8, %p3466_p5 }
  0x1c   : > { %p3469_p9 = pnand %p3468_p10, %p3464_p7 }
  0x1e   : > { %3472 = shalt.err (!%p3469_p9)
}
  0x1f   : > { %s3473_s20 = scalar_lea.vmem %s150_s6, 1344  ;;  %s3554_s25 = smov [#allocation3]  }
  0x20   : > { %p3474_p0 = scmp.ne.s32.totalorder %s150_s6, %s3473_s20  ;;  %s3478_s26 = sshll.u32 %s3554_s25, 4  ;;  %s3479_s26 = int_to_ptr.vmem [resolvable:$false] %s3478_s26 }
  0x21   : > { %s3480_s27 = scalar_lea.vmem %s3479_s26, 2688  ;;  %p3481_p2 = scmp.lt.s32.totalorder %s150_s6, %s3479_s26 }
  0x22   : > { %p3476_p1 = pnand %p3474_p0, %p3462_p3  ;;  %p3482_p4 = scmp.lt.s32.totalorder %s3480_s27, %s3473_s20 }
  0x24   : > { %p3477_p12 = pneg %p3476_p1  ;;  %p3483_p11 = por %p3482_p4, %p3481_p2 }
  0x26   : > { %p3484_p6 = pnand %p3483_p11, %p3477_p12 }
  0x28   : > { %3487 = shalt.err (!%p3484_p6)
}
  0x29   : > { %3404 = dma.hbm_to_vmem [thread:$0]  (!%p3644_p13), %s3642_s30, 1344, %s150_s6, %s138_s7  }
  0x2a   : > { %p4628_p9 = scmp.lt.s32.totalorder %s3552_s15, 3  ;;  %p4629_p7 = scmp.ge.s32.totalorder %s3552_s15, 1 }
  0x2c   : > { %p155_p5 = pnand %p4629_p7, %p4628_p9 }
  0x2d   : > { %s3669_s28 = sand.u32 (!%p155_p5), 1, %s3544_s13   ;;  %p4630_p6 = scmp.ne.s32.totalorder (!%p155_p5), %s4624_s22, 0 }
  0x2e   : > { %158 = sbr.rel (%p155_p5) target bundleno = 621 (0x26d), region = 32  ;;  %s161_s5 = scalar_lea.sflag (!%p155_p5), [#allocation4], %s3669_s28 }
  0x2f   : > { %s3396_s29 = smul.u32 (!%p155_p5), 84, %s3669_s28 }
  0x31   : > { %s3673_s8 = scalar_lea.vmem (!%p155_p5), [#allocation3], %s3396_s29 }
  0x33   : > { %3531 = dma.done.wait (%p4630_p6), %s161_s5, 1344  }
  0x34   : > { %3533 = vsyncadd (%p4630_p6), %s161_s5, 4294965952  ;;  %v3680_v0 = vld [vmem:[%s3673_s8 + $0x20] sm:$0xff]  ;;  %v3683_v1 = vld [vmem:[%s3673_s8 + $0x10] sm:$0xff]  ;;  %s3555_s30 = smov 126   ;;  %s3556_s22 = smov 125   ;;  %vm224_vm0 = vcmask 1043456  }
  0x35   : > { %449 = vrot.lane.b32.xlu1 %v3680_v0, %s3555_s30  ;;  %445 = vrot.lane.b32.xlu0 %v3683_v1, %s3555_s30  ;;  %v3690_v2 = vld [vmem:[%s3673_s8] sm:$0xff]  ;;  %v3693_v3 = vld [vmem:[%s3673_s8 + $0x18] sm:$0xff]  ;;  %s3557_s4 = smov 127   ;;  %s3558_s6 = smov 124   ;;  %vm2099_vm1 = vcmask 588800   ;;  %vm469_vm2 = vcmask 1031168  }
  0x36   : > { %v3700_v4 = vld [vmem:[%s3673_s8 + $0x8] sm:$0xff]  ;;  %v215_v6 = vrot.slane %v3690_v2, 4  ;;  %v3746_v10 = vld [vmem:[%s3673_s8 + $0x30] sm:$0xff]  ;;  %v3773_v13 = vld [vmem:[%s3673_s8 + $0x38] sm:$0xff]  ;;  %vm613_vm3 = vcmask 1022976   ;;  %v3559_v31 = vmov 0  }
  0x37   : > { %v216_v5 = vrot.slane %v3700_v4, 4  ;;  %v3749_v11 = vld [vmem:[%s3673_s8 + $0x28] sm:$0xff]  ;;  %v429_v14 = vld [vmem:[%s3673_s8 + $0x40] sm:$0xff]  ;;  %v431_v16 = vld [vmem:[%s3673_s8 + $0x50] sm:$0xf]  ;;  %3450 = vset.pattern.permute.xlu0 %v3559_v31  ;;  %3451 = vset.pattern.permute.xlu1 %v3559_v31  ;;  %vm325_vm4 = vcmask 1039360  }
  0x38   : > { %v3770_v12 = vld [vmem:[%s4619_s1 + $0x4] ss:$8 sps:$4 sm:$0xff]   ;;  %vm757_vm5 = vcmask 1014784   ;;  %s3393_s11 = sshll.u32 %s3604_s16, 12  ;;  %s2996_s16 = scalar_lea.sflag [#allocation5], %s3669_s28 }
  0x39   : > { %585 = vrot.lane.b32.xlu1 %v3690_v2, %s3556_s22  ;;  %447 = vrot.lane.b32.xlu0 %v3693_v3, %s3555_s30  ;;  %v3731_v7 = vsel %vm224_vm0, %v215_v6, %v216_v5  ;;  %v430_v15 = vld [vmem:[%s3673_s8 + $0x48] sm:$0xff]  ;;  %v287_v17 = vld [vmem:[%s3673_s8 + $0x50] sm:$0xf]  ;;  %s4571_s25 = scalar_lea.hbm %s4621_s3, %s3393_s11  ;;  %p4631_p12 = scmp.ne.s32.totalorder %s4625_s23, 0 }
  0x3a   : > { %v3093_v8 = vcombine.high %v3690_v2, %v3731_v7  ;;  %v3092_v9 = vcombine.low %v3690_v2, %v3731_v7  ;;  %3301 = vmatprep.mubr.msk.bf16.mxu0 %vm2099_vm1, %v3770_v12  ;;  %3304 = vmatprep.mubr.msk.bf16.mxu1 %vm2099_vm1, %v3770_v12  ;;  %v719_v18 = vld [vmem:[%s3673_s8 + $0x50] sm:$0xf]  ;;  %v1058_v39 = vld [vmem:[%s4620_s2 + $0x8] sm:$0xff]  ;;  %s3560_s27 = smov [#allocation6]  }
  0x3b   : > { %v575_v19 = vld [vmem:[%s3673_s8 + $0x50] sm:$0xf]  ;;  %s3492_s29 = sshll.u32 %s3560_s27, 4  ;;  %s3493_s29 = int_to_ptr.vmem [resolvable:$false] %s3492_s29 }
  0x3c   : > { %v1057_v27 = vld [vmem:[%s4620_s2] sm:$0xff]  ;;  %s3494_s5 = scalar_lea.vmem %s3493_s29, 8192 }
  0x3d   : > { %589 = vrot.lane.b32.xlu1 %v3683_v1, %s3556_s22  ;;  %587 = vrot.lane.b32.xlu0 %v3700_v4, %s3556_s22 }
  0x41   : > { %443 = vrot.lane.b32.xlu0 %v3700_v4, %s3555_s30  ;;  %441 = vrot.lane.b32.xlu1 %v3690_v2, %s3555_s30 }
  0x45   : > { %301 = vrot.lane.b32.xlu1 %v3683_v1, %s3557_s4  ;;  %299 = vrot.lane.b32.xlu0 %v3700_v4, %s3557_s4 }
  0x49   : > { %305 = vrot.lane.b32.xlu1 %v3680_v0, %s3557_s4  ;;  %303 = vrot.lane.b32.xlu0 %v3693_v3, %s3557_s4 }
  0x4d   : > { %733 = vrot.lane.b32.xlu1 %v3683_v1, %s3558_s6  ;;  %297 = vrot.lane.b32.xlu0 %v3690_v2, %s3557_s4 }
  0x51   : > { %737 = vrot.lane.b32.xlu1 %v3680_v0, %s3558_s6  ;;  %735 = vrot.lane.b32.xlu0 %v3693_v3, %s3558_s6 }
  0x55   : > { %729 = vrot.lane.b32.xlu1 %v3690_v2, %s3558_s6  ;;  %731 = vrot.lane.b32.xlu0 %v3700_v4, %s3558_s6 }
  0x59   : > { %593 = vrot.lane.b32.xlu1 %v3680_v0, %s3556_s22  ;;  %591 = vrot.lane.b32.xlu0 %v3693_v3, %s3556_s22 }
  0x5d   : > { %453 = vrot.lane.b32.xlu1 %v3746_v10, %s3555_s30  ;;  %451 = vrot.lane.b32.xlu0 %v3749_v11, %s3555_s30 }
  0x61   : > { %309 = vrot.lane.b32.xlu1 %v3746_v10, %s3557_s4  ;;  %307 = vrot.lane.b32.xlu0 %v3749_v11, %s3557_s4 }
  0x65   : > { %741 = vrot.lane.b32.xlu1 %v3746_v10, %s3558_s6  ;;  %739 = vrot.lane.b32.xlu0 %v3749_v11, %s3558_s6 }
  0x69   : > { %597 = vrot.lane.b32.xlu1 %v3746_v10, %s3556_s22  ;;  %595 = vrot.lane.b32.xlu0 %v3749_v11, %s3556_s22 }
  0x6d   : > { %455 = vrot.lane.b32.xlu0 %v3773_v13, %s3555_s30  ;;  %457 = vrot.lane.b32.xlu1 %v429_v14, %s3555_s30 }
  0x71   : > { %311 = vrot.lane.b32.xlu0 %v3773_v13, %s3557_s4  ;;  %313 = vrot.lane.b32.xlu1 %v429_v14, %s3557_s4 }
  0x75   : > { %743 = vrot.lane.b32.xlu0 %v3773_v13, %s3558_s6  ;;  %745 = vrot.lane.b32.xlu1 %v429_v14, %s3558_s6 }
  0x79   : > { %599 = vrot.lane.b32.xlu0 %v3773_v13, %s3556_s22  ;;  %601 = vrot.lane.b32.xlu1 %v429_v14, %s3556_s22 }
  0x7d   : > { %526 = vrot.lane.b32.xlu0 %v430_v15, %s3555_s30  ;;  %551 = vrot.lane.b32.xlu1 %v431_v16, %s3555_s30 }
  0x81   : > { %382 = vrot.lane.b32.xlu0 %v430_v15, %s3557_s4  ;;  %407 = vrot.lane.b32.xlu1 %v287_v17, %s3557_s4 }
  0x85   : > { %814 = vrot.lane.b32.xlu0 %v430_v15, %s3558_s6  ;;  %839 = vrot.lane.b32.xlu1 %v719_v18, %s3558_s6 }
  0x89   : > { %670 = vrot.lane.b32.xlu0 %v430_v15, %s3556_s22  ;;  %695 = vrot.lane.b32.xlu1 %v575_v19, %s3556_s22 }
  0x8d   : > { %1063 = vperm.xlu0 %3450, %v1057_v27   ;;  %1068 = vperm.xlu1 %3451, %v1058_v39  }
  0xa7   : > { %v3805_v20 = vpop.permute.xlu1 %449  ;;  %v446_v21 = vpop.permute.xlu0 %445 }
  0xa8   : > { %v463_v25 = vrot.slane %v3805_v20, 4  ;;  %v461_v26 = vrot.slane %v446_v21, 4 }
  0xab   : > { %v586_v22 = vpop.permute.xlu1 %585  ;;  %v448_v23 = vpop.permute.xlu0 %447 }
  0xac   : > { %v462_v24 = vrot.slane %v448_v23, 4  ;;  %v603_v32 = vrot.slane %v586_v22, 4 }
  0xae   : > { %v3814_v28 = vsel %vm224_vm0, %v462_v24, %v463_v25  ;;  %v473_v33 = vsel %vm224_vm0, %v461_v26, %v462_v24 }
  0xaf   : > { %v3816_v29 = vpop.permute.xlu1 %589  ;;  %v3818_v30 = vpop.permute.xlu0 %587  ;;  %v3825_v36 = vsel %vm469_vm2, %v448_v23, %v3814_v28  ;;  %v503_v40 = vsel %vm469_vm2, %v473_v33, %v448_v23  ;;  %v474_v44 = vsel %vm469_vm2, %v446_v21, %v473_v33 }
  0xb0   : > { %v605_v34 = vrot.slane %v3816_v29, 4  ;;  %v604_v35 = vrot.slane %v3818_v30, 4  ;;  %v3853_v54 = vcombine.high %v474_v44, %v503_v40  ;;  %v3860_v63 = vcombine.low %v474_v44, %v503_v40 }
  0xb2   : > { %v3830_v37 = vsel %vm224_vm0, %v604_v35, %v605_v34  ;;  %v3833_v38 = vsel %vm224_vm0, %v603_v32, %v604_v35 }
  0xb3   : > { %v3842_v41 = vsel %vm613_vm3, %v3818_v30, %v3830_v37  ;;  %v444_v42 = vpop.permute.xlu0 %443  ;;  %v442_v43 = vpop.permute.xlu1 %441  ;;  %v614_v45 = vsel %vm613_vm3, %v586_v22, %v3833_v38 }
  0xb4   : > { %v460_v46 = vrot.slane %v444_v42, 4  ;;  %v459_v47 = vrot.slane %v442_v43, 4  ;;  %v3205_v48 = vcombine.high %v474_v44, %v614_v45  ;;  %v3207_v49 = vcombine.high %v3825_v36, %v3842_v41 }
  0xb5   : > { %v3204_v50 = vcombine.low %v474_v44, %v614_v45  ;;  %v3206_v51 = vcombine.low %v3825_v36, %v3842_v41  ;;  %v217_v45 = vrot.slane %v3683_v1, 4 }
  0xb6   : > { %v471_v52 = vsel %vm224_vm0, %v460_v46, %v461_v26  ;;  %v468_v53 = vsel %vm224_vm0, %v459_v47, %v460_v46  ;;  %2155 = vmatprep.subr.bf16.mxu0 %v3205_v48  ;;  %2208 = vmatprep.subr.bf16.mxu1 %v3207_v49  ;;  %v218_v46 = vrot.slane %v3693_v3, 4 }
  0xb7   : > { %v472_v55 = vsel %vm469_vm2, %v444_v42, %v471_v52  ;;  %2156 = vmatpush1.bf16.msra.mxu0 %v3204_v50  ;;  %2209 = vmatpush1.bf16.msra.mxu1 %v3206_v51  ;;  %v302_v56 = vpop.permute.xlu1 %301  ;;  %v300_v57 = vpop.permute.xlu0 %299  ;;  %v470_v60 = vsel %vm469_vm2, %v442_v43, %v468_v53  ;;  %v501_v61 = vsel %vm469_vm2, %v468_v53, %v444_v42 }
  0xb8   : > { %v317_v58 = vrot.slane %v302_v56, 4  ;;  %v316_v59 = vrot.slane %v300_v57, 4  ;;  %2210 = vmatprep.subr.bf16.mxu1 %v3853_v54  ;;  %v502_v62 = vsel %vm469_vm2, %v471_v52, %v446_v21  ;;  %v3173_v17 = vcombine.high %v470_v60, %v501_v61 }
  0xb9   : > { %v3175_v6 = vcombine.high %v472_v55, %v502_v62  ;;  %v3174_v14 = vcombine.low %v472_v55, %v502_v62  ;;  %v3172_v21 = vcombine.low %v470_v60, %v501_v61 }
  0xba   : > { %v327_v18 = vsel %vm224_vm0, %v316_v59, %v317_v58 }
  0xbb   : > { %2211 = vmatpush1.bf16.msra.mxu1 %v3860_v63  ;;  %v3863_v15 = vpop.permute.xlu1 %305  ;;  %v304_v16 = vpop.permute.xlu0 %303  ;;  %2157 = vmatprep.subr.bf16.mxu0 %v3175_v6  ;;  %v358_v35 = vsel %vm325_vm4, %v327_v18, %v302_v56  ;;  %v328_v48 = vsel %vm325_vm4, %v300_v57, %v327_v18 }
  0xbc   : > { %v319_v19 = vrot.slane %v3863_v15, 4  ;;  %v318_v22 = vrot.slane %v304_v16, 4  ;;  %2212 = vmatprep.subr.bf16.mxu1 %v3175_v6  ;;  %2158 = vmatpush1.bf16.msra.mxu0 %v3174_v14  ;;  %v3126_v6 = vcombine.low %v3693_v3, %v328_v48 }
  0xbd   : > { %2159 = vmatprep.subr.bf16.mxu0 %v3173_v17 }
  0xbe   : > { %v329_v23 = vsel %vm224_vm0, %v317_v58, %v318_v22  ;;  %v3871_v24 = vsel %vm224_vm0, %v318_v22, %v319_v19 }
  0xbf   : > { %v3875_v26 = vsel %vm325_vm4, %v304_v16, %v3871_v24  ;;  %v359_v27 = vsel %vm325_vm4, %v329_v23, %v304_v16  ;;  %2213 = vmatpush1.bf16.msra.mxu1 %v3174_v14  ;;  %v3878_v31 = vpop.permute.xlu1 %733  ;;  %v298_v32 = vpop.permute.xlu0 %297  ;;  %v3881_v33 = vsel %vm325_vm4, %v302_v56, %v329_v23  ;;  %v227_v56 = vsel %vm224_vm0, %v217_v45, %v218_v46 }
  0xc0   : > { %v315_v39 = vrot.slane %v298_v32, 4  ;;  %v3143_v40 = vcombine.high %v358_v35, %v3881_v33  ;;  %v3886_v42 = vcombine.high %v359_v27, %v3875_v26  ;;  %2160 = vmatpush1.bf16.msra.mxu0 %v3172_v21  ;;  %v3142_v43 = vcombine.low %v358_v35, %v3881_v33 }
  0xc1   : > { %v3890_v44 = vcombine.low %v359_v27, %v3875_v26  ;;  %v3912_v62 = vcombine.high %v3683_v1, %v227_v56  ;;  %v749_v14 = vrot.slane %v3878_v31, 4  ;;  %v3924_v21 = vcombine.low %v3683_v1, %v227_v56 }
  0xc2   : > { %v324_v47 = vsel %vm224_vm0, %v315_v39, %v316_v59  ;;  %2161 = vmatprep.subr.bf16.mxu0 %v3143_v40  ;;  %2214 = vmatprep.subr.bf16.mxu1 %v3886_v42  ;;  %v3127_v59 = vcombine.high %v3693_v3, %v328_v48 }
  0xc3   : > { %2215 = vmatpush1.bf16.msra.mxu1 %v3890_v44  ;;  %v357_v49 = vsel %vm325_vm4, %v324_v47, %v300_v57  ;;  %v326_v50 = vsel %vm325_vm4, %v298_v32, %v324_v47  ;;  %v3900_v51 = vpop.permute.xlu1 %737  ;;  %v736_v52 = vpop.permute.xlu0 %735  ;;  %v226_v57 = vsel %vm224_vm0, %v216_v5, %v217_v45 }
  0xc4   : > { %2216 = vmatprep.subr.bf16.mxu1 %v3143_v40  ;;  %2162 = vmatpush1.bf16.msra.mxu0 %v3142_v43  ;;  %v3141_v53 = vcombine.high %v357_v49, %v328_v48  ;;  %v3140_v55 = vcombine.low %v357_v49, %v328_v48  ;;  %v751_v58 = vrot.slane %v3900_v51, 4  ;;  %v3125_v60 = vcombine.high %v3683_v1, %v326_v50 }
  0xc5   : > { %v750_v61 = vrot.slane %v736_v52, 4  ;;  %v3095_v5 = vcombine.high %v3700_v4, %v226_v57  ;;  %v3124_v17 = vcombine.low %v3683_v1, %v326_v50  ;;  %v3094_v27 = vcombine.low %v3700_v4, %v226_v57 }
  0xc6   : > { %2163 = vmatprep.subr.bf16.mxu0 %v3141_v53 }
  0xc7   : > { %2217 = vmatpush1.bf16.msra.mxu1 %v3142_v43  ;;  %v3919_v16 = vsel %vm224_vm0, %v750_v61, %v751_v58  ;;  %v730_v18 = vpop.permute.xlu1 %729  ;;  %v732_v22 = vpop.permute.xlu0 %731  ;;  %v761_v32 = vsel %vm224_vm0, %v749_v14, %v750_v61 }
  0xc8   : > { %2218 = vmatprep.subr.bf16.mxu1 %v3127_v59  ;;  %2164 = vmatpush1.bf16.msra.mxu0 %v3140_v55  ;;  %v3929_v23 = vsel %vm757_vm5, %v736_v52, %v3919_v16  ;;  %v748_v35 = vrot.slane %v732_v22, 4  ;;  %v762_v39 = vsel %vm757_vm5, %v3878_v31, %v761_v32  ;;  %v747_v45 = vrot.slane %v730_v18, 4 }
  0xc9   : > { %2165 = vmatprep.subr.bf16.mxu0 %v3125_v60  ;;  %v3287_v1 = vcombine.high %v3929_v23, %v3929_v23  ;;  %v3286_v47 = vcombine.low %v3929_v23, %v3929_v23  ;;  %v791_v48 = vsel %vm757_vm5, %v761_v32, %v736_v52  ;;  %v3285_v53 = vcombine.high %v762_v39, %v762_v39 }
  0xca   : > { %v759_v4 = vsel %vm224_vm0, %v748_v35, %v749_v14  ;;  %v3284_v55 = vcombine.low %v762_v39, %v762_v39  ;;  %v756_v59 = vsel %vm224_vm0, %v747_v45, %v748_v35  ;;  %v3958_v57 = vcombine.high %v762_v39, %v791_v48 }
  0xcb   : > { %2219 = vmatpush1.bf16.msra.mxu1 %v3126_v6  ;;  %v3938_v40 = vpop.permute.xlu1 %593  ;;  %v592_v43 = vpop.permute.xlu0 %591  ;;  %v760_v56 = vsel %vm757_vm5, %v732_v22, %v759_v4  ;;  %v2114_v52 = vsel %vm224_vm0, %v3286_v47, 0  ;;  %v3971_v61 = vcombine.low %v762_v39, %v791_v48  ;;  %v758_v6 = vsel %vm757_vm5, %v730_v18, %v756_v59  ;;  %v1060_v18 = vld [vmem:[%s4620_s2 + $0x18] sm:$0xff] }
  0xcc   : > { %2220 = vmatprep.subr.bf16.mxu1 %v3912_v62  ;;  %2166 = vmatpush1.bf16.msra.mxu0 %v3124_v17  ;;  %v607_v49 = vrot.slane %v3938_v40, 4  ;;  %v606_v50 = vrot.slane %v592_v43, 4  ;;  %v2108_v7 = vsel %vm224_vm0, %v3284_v55, 0 }
  0xcd   : > { %2167 = vmatprep.subr.bf16.mxu0 %v3095_v5  ;;  %1078 = vperm.xlu0 %3450, %v1060_v18  }
  0xce   : > { %v617_v60 = vsel %vm224_vm0, %v605_v34, %v606_v50  ;;  %v3966_v2 = vsel %vm224_vm0, %v606_v50, %v607_v49  ;;  %v1059_v34 = vld [vmem:[%s4620_s2 + $0x10] sm:$0xff] }
  0xcf   : > { %2221 = vmatpush1.bf16.msra.mxu1 %v3924_v21  ;;  %v620_v14 = vsel %vm613_vm3, %v592_v43, %v3966_v2  ;;  %v3980_v17 = vpop.permute.xlu1 %453  ;;  %1073 = vperm.xlu1 %3451, %v1059_v34   ;;  %v504_v34 = vsel %vm469_vm2, %v3814_v28, %v3805_v20 }
  0xd0   : > { %2222 = vmatprep.subr.bf16.mxu1 %v3095_v5  ;;  %2168 = vmatpush1.bf16.msra.mxu0 %v3094_v27  ;;  %v647_v5 = vsel %vm613_vm3, %v617_v60, %v592_v43  ;;  %v3179_v28 = vcombine.high %v3825_v36, %v504_v34 }
  0xd1   : > { %2169 = vmatprep.subr.bf16.mxu0 %v3093_v8  ;;  %v790_v8 = vsel %vm757_vm5, %v759_v4, %v3878_v31  ;;  %v789_v31 = vsel %vm757_vm5, %v756_v59, %v732_v22  ;;  %v465_v22 = vrot.slane %v3980_v17, 4  ;;  %v3989_v43 = vcombine.high %v647_v5, %v620_v14 }
  0xd2   : > { %v3254_v32 = vcombine.low %v760_v56, %v790_v8  ;;  %v3253_v35 = vcombine.high %v758_v6, %v789_v31  ;;  %v3252_v45 = vcombine.low %v758_v6, %v789_v31  ;;  %v646_v4 = vsel %vm613_vm3, %v3830_v37, %v3816_v29 }
  0xd3   : > { %2223 = vmatpush1.bf16.msra.mxu1 %v3094_v27  ;;  %v452_v27 = vpop.permute.xlu0 %451  ;;  %v4000_v50 = vcombine.low %v647_v5, %v620_v14  ;;  %v4016_v59 = vpop.permute.xlu1 %309  ;;  %v4034_v5 = vld [vmem:[%s4619_s1 + $0x14] ss:$8 sps:$4 sm:$0xff]  }
  0xd4   : > { %3303 = vmatprep.subr.msk.bf16.mxu1 %vm224_vm0, %v3287_v1  ;;  %2170 = vmatpush1.bf16.msra.mxu0 %v3092_v9  ;;  %v3255_v9 = vcombine.high %v760_v56, %v790_v8  ;;  %v618_v1 = vsel %vm613_vm3, %v3816_v29, %v617_v60  ;;  %v464_v39 = vrot.slane %v452_v27, 4 }
  0xd5   : > { %3300 = vmatprep.subr.msk.bf16.mxu0 %vm224_vm0, %v3285_v53  ;;  %v3223_v48 = vcombine.high %v646_v4, %v618_v1  ;;  %v645_v53 = vsel %vm613_vm3, %v3833_v38, %v3818_v30  ;;  %v3222_v55 = vcombine.low %v646_v4, %v618_v1  ;;  %v4022_v38 = vld [vmem:[%s4619_s1] ss:$8 sps:$4 sm:$0xff]  }
  0xd6   : > { %v3997_v47 = vsel %vm224_vm0, %v464_v39, %v465_v22  ;;  %v477_v29 = vsel %vm224_vm0, %v463_v25, %v464_v39  ;;  %v3221_v56 = vcombine.high %v645_v53, %v3842_v41  ;;  %v3220_v60 = vcombine.low %v645_v53, %v3842_v41 }
  0xd7   : > { %2231 = vmatpush2.bf16.msra.mxu1 %v2114_v52  ;;  %v4010_v37 = vsel %vm469_vm2, %v452_v27, %v3997_v47  ;;  %v478_v8 = vsel %vm469_vm2, %v3805_v20, %v477_v29  ;;  %v308_v30 = vpop.permute.xlu0 %307  ;;  %v505_v52 = vsel %vm469_vm2, %v477_v29, %v452_v27  ;;  %v220_v53 = vrot.slane %v3749_v11, 4 }
  0xd8   : > { %2232 = vmatprep.subr.bf16.mxu1 %v3958_v57  ;;  %2178 = vmatpush2.bf16.msra.mxu0 %v2108_v7  ;;  %v3211_v25 = vcombine.high %v4010_v37, %v620_v14  ;;  %v321_v7 = vrot.slane %v4016_v59, 4  ;;  %v3209_v31 = vcombine.high %v478_v8, %v618_v1  ;;  %v3210_v6 = vcombine.low %v4010_v37, %v620_v14 }
  0xd9   : > { %2179 = vmatprep.subr.bf16.mxu0 %v3255_v9  ;;  %v4037_v41 = vcombine.high %v478_v8, %v505_v52  ;;  %v3208_v27 = vcombine.low %v478_v8, %v618_v1  ;;  %v3178_v1 = vcombine.low %v3825_v36, %v504_v34  ;;  %v360_v36 = vsel %vm325_vm4, %v3871_v24, %v3863_v15  ;;  %v4095_v24 = vpop.permute.xlu1 %741 }
  0xdb   : > { %2233 = vmatpush2.bf16.msra.mxu1 %v3971_v61  ;;  %v740_v29 = vpop.permute.xlu0 %739 }
  0xdc   : > { %2234 = vmatprep.subr.bf16.mxu1 %v3255_v9  ;;  %2180 = vmatpush2.bf16.msra.mxu0 %v3254_v32  ;;  %v320_v9 = vrot.slane %v308_v30, 4 }
  0xdd   : > { %2181 = vmatprep.subr.bf16.mxu0 %v3253_v35  ;;  %v4140_v34 = vpop.permute.xlu1 %597 }
  0xde   : > { %v333_v14 = vsel %vm224_vm0, %v319_v19, %v320_v9  ;;  %v4045_v20 = vsel %vm224_vm0, %v320_v9, %v321_v7  ;;  %v4059_v19 = vld [vmem:[%s4619_s1 + $0x10] ss:$8 sps:$4 sm:$0xff]   ;;  %v3128_v9 = vcombine.low %v3680_v0, %v3881_v33 }
  0xdf   : > { %2235 = vmatpush2.bf16.msra.mxu1 %v3254_v32  ;;  %v4050_v32 = vcombine.low %v478_v8, %v505_v52  ;;  %v4063_v35 = vsel %vm325_vm4, %v308_v30, %v4045_v20  ;;  %v361_v18 = vsel %vm325_vm4, %v333_v14, %v308_v30  ;;  %v4070_v39 = vsel %vm325_vm4, %v3863_v15, %v333_v14 }
  0xe0   : > { %2236 = vmatprep.subr.bf16.mxu1 %v3989_v43  ;;  %2182 = vmatpush2.bf16.msra.mxu0 %v3252_v45  ;;  %v4074_v45 = vcombine.high %v361_v18, %v4063_v35  ;;  %v3147_v4 = vcombine.high %v360_v36, %v4070_v39  ;;  %v3146_v15 = vcombine.low %v360_v36, %v4070_v39  ;;  %v752_v30 = vrot.slane %v740_v29, 4 }
  0xe1   : > { %2183 = vmatprep.subr.bf16.mxu0 %v3223_v48  ;;  %v609_v14 = vrot.slane %v4140_v34, 4  ;;  %v792_v36 = vsel %vm757_vm5, %v3919_v16, %v3900_v51 }
  0xe3   : > { %2237 = vmatpush2.bf16.msra.mxu1 %v4000_v50 }
  0xe4   : > { %2238 = vmatprep.subr.bf16.mxu1 %v3223_v48  ;;  %2184 = vmatpush2.bf16.msra.mxu0 %v3222_v55  ;;  %v219_v48 = vrot.slane %v3680_v0, 4 }
  0xe5   : > { %2185 = vmatprep.subr.bf16.mxu0 %v3221_v56  ;;  %v3131_v56 = vcombine.high %v3749_v11, %v3875_v26 }
  0xe6   : > { %v228_v8 = vsel %vm224_vm0, %v218_v46, %v219_v48 }
  0xe7   : > { %2239 = vmatpush2.bf16.msra.mxu1 %v3222_v55  ;;  %v753_v55 = vrot.slane %v4095_v24, 4  ;;  %v3099_v46 = vcombine.high %v3693_v3, %v228_v8 }
  0xe8   : > { %2314 = vmatprep.subr.bf16.mxu1 %v3211_v25  ;;  %2186 = vmatpush2.bf16.msra.mxu0 %v3220_v60  ;;  %v3129_v25 = vcombine.high %v3680_v0, %v3881_v33 }
  0xe9   : > { %2261 = vmatprep.subr.bf16.mxu0 %v3209_v31  ;;  %v4118_v60 = vsel %vm224_vm0, %v752_v30, %v753_v55 }
  0xea   : > { %2241 = vmatmul.mubr.bf16.vlgmr.msra.gmra.mxu1 %v4022_v38 }
  0xeb   : > { %2315 = vmatpush1.bf16.msra.mxu1 %v3210_v6  ;;  %2188 = vmatmul.mubr.bf16.vlgmr.msra.gmra.mxu0 %v4022_v38  ;;  %v765_v6 = vsel %vm224_vm0, %v751_v58, %v752_v30 }
  0xec   : > { %2316 = vmatprep.subr.bf16.mxu1 %v4037_v41  ;;  %2262 = vmatpush1.bf16.msra.mxu0 %v3208_v27  ;;  %v766_v33 = vsel %vm757_vm5, %v3900_v51, %v765_v6  ;;  %v596_v27 = vpop.permute.xlu0 %595  ;;  %v793_v58 = vsel %vm757_vm5, %v765_v6, %v740_v29  ;;  %v3259_v51 = vcombine.high %v3929_v23, %v792_v36 }
  0xed   : > { %3302 = vmatprep.mubr.msk.bf16.mxu0 %vm2099_vm1, %v4034_v5  ;;  %2263 = vmatprep.subr.bf16.mxu0 %v3179_v28  ;;  %v4167_v16 = vcombine.low %v766_v33, %v793_v58 }
  0xee   : > { %3305 = vmatprep.mubr.msk.bf16.mxu1 %vm2099_vm1, %v4034_v5 }
  0xef   : > { %2317 = vmatpush1.bf16.msra.mxu1 %v4050_v32 }
  0xf0   : > { %2318 = vmatprep.subr.bf16.mxu1 %v3179_v28  ;;  %2264 = vmatpush1.bf16.msra.mxu0 %v3178_v1  ;;  %v608_v28 = vrot.slane %v596_v27, 4 }
  0xf1   : > { %2265 = vmatprep.subr.bf16.mxu0 %v3853_v54  ;;  %v4086_v54 = vcombine.low %v361_v18, %v4063_v35  ;;  %v3289_v18 = vcombine.high %v766_v33, %v766_v33 }
  0xf2   : > { %2251 = vmatmul.mubr.bf16.gmra.mxu1 %v4059_v19 }
  0xf3   : > { %2319 = vmatpush1.bf16.msra.mxu1 %v3178_v1  ;;  %3310 = vmatprep.mubr.msk.bf16.mxu1 %vm2099_vm1, %v3770_v12  ;;  %v3288_v1 = vcombine.low %v766_v33, %v766_v33 }
  0xf4   : > { %2320 = vmatprep.subr.bf16.mxu1 %v4074_v45  ;;  %2198 = vmatmul.mubr.bf16.gmra.mxu0 %v4059_v19 }
  0xf5   : > { %2266 = vmatpush1.bf16.msra.mxu0 %v3860_v63  ;;  %3307 = vmatprep.mubr.msk.bf16.mxu0 %vm2099_vm1, %v3770_v12  ;;  %v229_v63 = vsel %vm224_vm0, %v219_v48, %v220_v53  ;;  %v621_v48 = vsel %vm224_vm0, %v607_v49, %v608_v28 }
  0xf6   : > { %2267 = vmatprep.subr.bf16.mxu0 %v3147_v4  ;;  %v4110_v52 = vcombine.high %v3680_v0, %v229_v63  ;;  %v4124_v31 = vcombine.low %v3680_v0, %v229_v63  ;;  %v649_v49 = vsel %vm613_vm3, %v621_v48, %v596_v27  ;;  %v456_v63 = vpop.permute.xlu0 %455 }
  0xf7   : > { %2321 = vmatpush1.bf16.msra.mxu1 %v4086_v54 }
  0xf8   : > { %2322 = vmatprep.subr.bf16.mxu1 %v3147_v4  ;;  %v4154_v4 = vcombine.high %v766_v33, %v793_v58 }
  0xf9   : > { %2268 = vmatpush1.bf16.msra.mxu0 %v3146_v15 }
  0xfa   : > { %2269 = vmatprep.subr.bf16.mxu0 %v3886_v42  ;;  %v3130_v42 = vcombine.low %v3749_v11, %v3875_v26  ;;  %v4129_v26 = vsel %vm757_vm5, %v740_v29, %v4118_v60 }
  0xfb   : > { %2323 = vmatpush1.bf16.msra.mxu1 %v3146_v15  ;;  %v3291_v0 = vcombine.high %v4129_v26, %v4129_v26  ;;  %v4162_v15 = vsel %vm224_vm0, %v608_v28, %v609_v14 }
  0xfc   : > { %2324 = vmatprep.subr.bf16.mxu1 %v3131_v56  ;;  %v624_v29 = vsel %vm613_vm3, %v596_v27, %v4162_v15  ;;  %v4172_v56 = vpop.permute.xlu1 %457  ;;  %v312_v27 = vpop.permute.xlu0 %311 }
  0xfd   : > { %2270 = vmatpush1.bf16.msra.mxu0 %v3890_v44  ;;  %v3098_v44 = vcombine.low %v3693_v3, %v228_v8  ;;  %v3290_v3 = vcombine.low %v4129_v26, %v4129_v26  ;;  %v3258_v8 = vcombine.low %v3929_v23, %v792_v36  ;;  %v467_v30 = vrot.slane %v4172_v56, 4 }
  0xfe   : > { %2271 = vmatprep.subr.bf16.mxu0 %v3129_v25  ;;  %v622_v25 = vsel %vm613_vm3, %v3938_v40, %v621_v48  ;;  %v4191_v6 = vcombine.low %v649_v49, %v624_v29 }
  0xff   : > { %2325 = vmatpush1.bf16.msra.mxu1 %v3130_v42  ;;  %v466_v42 = vrot.slane %v456_v63, 4 }
 0x100   : > { %2326 = vmatprep.subr.bf16.mxu1 %v4110_v52  ;;  %v4204_v33 = vpop.permute.xlu1 %313 }
 0x101   : > { %2272 = vmatpush1.bf16.msra.mxu0 %v3128_v9  ;;  %v648_v9 = vsel %vm613_vm3, %v3966_v2, %v3938_v40  ;;  %v4188_v23 = vsel %vm224_vm0, %v466_v42, %v467_v30 }
 0x102   : > { %2273 = vmatprep.subr.bf16.mxu0 %v3099_v46  ;;  %v4199_v40 = vsel %vm469_vm2, %v456_v63, %v4188_v23  ;;  %v3226_v2 = vcombine.low %v648_v9, %v622_v25 }
 0x103   : > { %2327 = vmatpush1.bf16.msra.mxu1 %v4124_v31  ;;  %v3214_v28 = vcombine.low %v4199_v40, %v624_v29 }
 0x104   : > { %2328 = vmatprep.subr.bf16.mxu1 %v3099_v46  ;;  %v4180_v46 = vcombine.high %v649_v49, %v624_v29 }
 0x105   : > { %2274 = vmatpush1.bf16.msra.mxu0 %v3098_v44 }
 0x106   : > { %2275 = vmatprep.subr.bf16.mxu0 %v3912_v62  ;;  %v2126_v62 = vsel %vm224_vm0, %v3290_v3, 0  ;;  %v323_v3 = vrot.slane %v4204_v33, 4 }
 0x107   : > { %2329 = vmatpush1.bf16.msra.mxu1 %v3098_v44  ;;  %v3227_v44 = vcombine.high %v648_v9, %v622_v25 }
 0x108   : > { %3309 = vmatprep.subr.msk.bf16.mxu1 %vm224_vm0, %v3291_v0 }
 0x109   : > { %2276 = vmatpush1.bf16.msra.mxu0 %v3924_v21  ;;  %v2120_v21 = vsel %vm224_vm0, %v3288_v1, 0  ;;  %v322_v1 = vrot.slane %v312_v27, 4 }
 0x10a   : > { %3306 = vmatprep.subr.msk.bf16.mxu0 %vm224_vm0, %v3289_v18  ;;  %v506_v18 = vsel %vm469_vm2, %v3997_v47, %v3980_v17 }
 0x10b   : > { %2337 = vmatpush2.bf16.msra.mxu1 %v2126_v62  ;;  %v337_v62 = vsel %vm224_vm0, %v321_v7, %v322_v1  ;;  %v362_v7 = vsel %vm325_vm4, %v4045_v20, %v4016_v59  ;;  %v222_v20 = vrot.slane %v3773_v13, 4 }
 0x10c   : > { %2338 = vmatprep.subr.bf16.mxu1 %v4154_v4  ;;  %v363_v48 = vsel %vm325_vm4, %v337_v62, %v312_v27 }
 0x10d   : > { %2284 = vmatpush2.bf16.msra.mxu0 %v2120_v21  ;;  %v3182_v21 = vcombine.low %v4010_v37, %v506_v18 }
 0x10e   : > { %2285 = vmatprep.subr.bf16.mxu0 %v3259_v51 }
 0x10f   : > { %2339 = vmatpush2.bf16.msra.mxu1 %v4167_v16 }
 0x110   : > { %2340 = vmatprep.subr.bf16.mxu1 %v3259_v51 }
 0x111   : > { %2286 = vmatpush2.bf16.msra.mxu0 %v3258_v8 }
 0x112   : > { %2287 = vmatprep.subr.bf16.mxu0 %v3958_v57  ;;  %v481_v57 = vsel %vm224_vm0, %v465_v22, %v466_v42 }
 0x113   : > { %2341 = vmatpush2.bf16.msra.mxu1 %v3258_v8  ;;  %v482_v0 = vsel %vm469_vm2, %v3980_v17, %v481_v57  ;;  %v507_v22 = vsel %vm469_vm2, %v481_v57, %v456_v63  ;;  %v3183_v17 = vcombine.high %v4010_v37, %v506_v18  ;;  %v744_v8 = vpop.permute.xlu0 %743  ;;  %v3133_v57 = vcombine.high %v3746_v10, %v4070_v39 }
 0x114   : > { %2342 = vmatprep.subr.bf16.mxu1 %v4180_v46  ;;  %v3213_v58 = vcombine.high %v482_v0, %v622_v25  ;;  %v3212_v36 = vcombine.low %v482_v0, %v622_v25  ;;  %v4228_v47 = vcombine.low %v482_v0, %v507_v22  ;;  %v4269_v25 = vpop.permute.xlu1 %745 }
 0x115   : > { %2288 = vmatpush2.bf16.msra.mxu0 %v3971_v61  ;;  %v3215_v61 = vcombine.high %v4199_v40, %v624_v29  ;;  %v4244_v29 = vsel %vm325_vm4, %v4016_v59, %v337_v62  ;;  %v755_v42 = vrot.slane %v4269_v25, 4 }
 0x116   : > { %2289 = vmatprep.subr.bf16.mxu0 %v3227_v44  ;;  %v3151_v49 = vcombine.high %v362_v7, %v4244_v29  ;;  %v3150_v63 = vcombine.low %v362_v7, %v4244_v29 }
 0x117   : > { %2343 = vmatpush2.bf16.msra.mxu1 %v4191_v6 }
 0x118   : > { %2344 = vmatprep.subr.bf16.mxu1 %v3227_v44  ;;  %v754_v44 = vrot.slane %v744_v8, 4 }
 0x119   : > { %2290 = vmatpush2.bf16.msra.mxu0 %v3226_v2 }
 0x11a   : > { %2291 = vmatprep.subr.bf16.mxu0 %v3989_v43  ;;  %v4216_v43 = vcombine.high %v482_v0, %v507_v22  ;;  %v4292_v0 = vsel %vm224_vm0, %v754_v44, %v755_v42 }
 0x11b   : > { %2345 = vmatpush2.bf16.msra.mxu1 %v3226_v2 }
 0x11c   : > { %2420 = vmatprep.subr.bf16.mxu1 %v3215_v61  ;;  %v3132_v61 = vcombine.low %v3746_v10, %v4070_v39 }
 0x11d   : > { %2292 = vmatpush2.bf16.msra.mxu0 %v4000_v50  ;;  %v4223_v50 = vsel %vm224_vm0, %v322_v1, %v323_v3 }
 0x11e   : > { %2367 = vmatprep.subr.bf16.mxu0 %v3213_v58  ;;  %2347 = vmatmul.mubr.bf16.vlgmr.msra.gmra.mxu1 %v4022_v38  ;;  %v4240_v51 = vsel %vm325_vm4, %v312_v27, %v4223_v50  ;;  %v769_v27 = vsel %vm224_vm0, %v753_v55, %v754_v44  ;;  %v4314_v58 = vpop.permute.xlu1 %601 }
 0x11f   : > { %2421 = vmatpush1.bf16.msra.mxu1 %v3214_v28  ;;  %3311 = vmatprep.mubr.msk.bf16.mxu1 %vm2099_vm1, %v4034_v5  ;;  %v4251_v37 = vcombine.high %v363_v48, %v4240_v51  ;;  %v4261_v59 = vcombine.low %v363_v48, %v4240_v51  ;;  %v770_v39 = vsel %vm757_vm5, %v4095_v24, %v769_v27  ;;  %v611_v28 = vrot.slane %v4314_v58, 4 }
 0x120   : > { %2294 = vmatmul.mubr.bf16.vlgmr.msra.gmra.mxu0 %v4022_v38  ;;  %2422 = vmatprep.subr.bf16.mxu1 %v4216_v43  ;;  %v795_v55 = vsel %vm757_vm5, %v769_v27, %v744_v8  ;;  %v3293_v18 = vcombine.high %v770_v39, %v770_v39  ;;  %v3292_v1 = vcombine.low %v770_v39, %v770_v39 }
 0x121   : > { %2368 = vmatpush1.bf16.msra.mxu0 %v3212_v36  ;;  %3308 = vmatprep.mubr.msk.bf16.mxu0 %vm2099_vm1, %v4034_v5  ;;  %v600_v36 = vpop.permute.xlu0 %599  ;;  %v4328_v48 = vcombine.high %v770_v39, %v795_v55 }
 0x122   : > { %2369 = vmatprep.subr.bf16.mxu0 %v3183_v17  ;;  %v2132_v7 = vsel %vm224_vm0, %v3292_v1, 0 }
 0x123   : > { %2423 = vmatpush1.bf16.msra.mxu1 %v4228_v47 }
 0x124   : > { %2424 = vmatprep.subr.bf16.mxu1 %v3183_v17  ;;  %v794_v17 = vsel %vm757_vm5, %v4118_v60, %v4095_v24  ;;  %v4338_v24 = vcombine.low %v770_v39, %v795_v55 }
 0x125   : > { %2370 = vmatpush1.bf16.msra.mxu0 %v3182_v21 }
 0x126   : > { %2371 = vmatprep.subr.bf16.mxu0 %v4037_v41  ;;  %2357 = vmatmul.mubr.bf16.gmra.mxu1 %v4059_v19  ;;  %v221_v41 = vrot.slane %v3746_v10, 4 }
 0x127   : > { %2425 = vmatpush1.bf16.msra.mxu1 %v3182_v21  ;;  %3316 = vmatprep.mubr.msk.bf16.mxu1 %vm2099_vm1, %v3770_v12 }
 0x128   : > { %2426 = vmatprep.subr.bf16.mxu1 %v4251_v37  ;;  %2304 = vmatmul.mubr.bf16.gmra.mxu0 %v4059_v19  ;;  %v230_v9 = vsel %vm224_vm0, %v220_v53, %v221_v41 }
 0x129   : > { %2372 = vmatpush1.bf16.msra.mxu0 %v4050_v32  ;;  %3313 = vmatprep.mubr.msk.bf16.mxu0 %vm2099_vm1, %v3770_v12  ;;  %v231_v32 = vsel %vm224_vm0, %v221_v41, %v222_v20  ;;  %v3135_v12 = vcombine.high %v3773_v13, %v4063_v35  ;;  %v3103_v53 = vcombine.high %v3749_v11, %v230_v9  ;;  %v527_v41 = vpop.permute.xlu0 %526 }
 0x12a   : > { %2373 = vmatprep.subr.bf16.mxu0 %v3151_v49  ;;  %v4284_v2 = vcombine.high %v3746_v10, %v231_v32  ;;  %v4298_v22 = vcombine.low %v3746_v10, %v231_v32  ;;  %v528_v44 = vrot.slane %v527_v41, 4 }
 0x12b   : > { %2427 = vmatpush1.bf16.msra.mxu1 %v4261_v59 }
 0x12c   : > { %2428 = vmatprep.subr.bf16.mxu1 %v3151_v49 }
 0x12d   : > { %2374 = vmatpush1.bf16.msra.mxu0 %v3150_v63 }
 0x12e   : > { %2375 = vmatprep.subr.bf16.mxu0 %v4074_v45  ;;  %v3134_v45 = vcombine.low %v3773_v13, %v4063_v35  ;;  %v4303_v35 = vsel %vm757_vm5, %v744_v8, %v4292_v0  ;;  %v3262_v8 = vcombine.low %v4129_v26, %v794_v17 }
 0x12f   : > { %2429 = vmatpush1.bf16.msra.mxu1 %v3150_v63  ;;  %v3295_v10 = vcombine.high %v4303_v35, %v4303_v35  ;;  %v552_v63 = vpop.permute.xlu1 %551 }
 0x130   : > { %2430 = vmatprep.subr.bf16.mxu1 %v3135_v12  ;;  %v553_v12 = vrot.slane %v552_v63, 4 }
 0x131   : > { %2376 = vmatpush1.bf16.msra.mxu0 %v4086_v54  ;;  %v3102_v54 = vcombine.low %v3749_v11, %v230_v9  ;;  %v3294_v11 = vcombine.low %v4303_v35, %v4303_v35 }
 0x132   : > { %2377 = vmatprep.subr.bf16.mxu0 %v3133_v57 }
 0x133   : > { %2431 = vmatpush1.bf16.msra.mxu1 %v3134_v45  ;;  %v2138_v62 = vsel %vm224_vm0, %v3294_v11, 0  ;;  %v508_v11 = vsel %vm469_vm2, %v4188_v23, %v4172_v56 }
 0x134   : > { %2432 = vmatprep.subr.bf16.mxu1 %v4284_v2 }
 0x135   : > { %2378 = vmatpush1.bf16.msra.mxu0 %v3132_v61  ;;  %v529_v61 = vsel %vm224_vm0, %v467_v30, %v528_v44 }
 0x136   : > { %2379 = vmatprep.subr.bf16.mxu0 %v3103_v53  ;;  %v540_v27 = vsel %vm469_vm2, %v529_v61, %v527_v41 }
 0x137   : > { %2433 = vmatpush1.bf16.msra.mxu1 %v4298_v22 }
 0x138   : > { %2434 = vmatprep.subr.bf16.mxu1 %v3103_v53 }
 0x139   : > { %2380 = vmatpush1.bf16.msra.mxu0 %v3102_v54 }
 0x13a   : > { %2381 = vmatprep.subr.bf16.mxu0 %v4110_v52  ;;  %v610_v52 = vrot.slane %v600_v36, 4 }
 0x13b   : > { %2435 = vmatpush1.bf16.msra.mxu1 %v3102_v54  ;;  %v408_v54 = vpop.permute.xlu1 %407 }
 0x13c   : > { %3315 = vmatprep.subr.msk.bf16.mxu1 %vm224_vm0, %v3295_v10  ;;  %v4333_v21 = vsel %vm224_vm0, %v610_v52, %v611_v28  ;;  %v625_v60 = vsel %vm224_vm0, %v609_v14, %v610_v52  ;;  %v650_v14 = vsel %vm613_vm3, %v4162_v15, %v4140_v34  ;;  %v530_v15 = vsel %vm469_vm2, %v4172_v56, %v529_v61  ;;  %v383_v10 = vpop.permute.xlu0 %382 }
 0x13d   : > { %2382 = vmatpush1.bf16.msra.mxu0 %v4124_v31  ;;  %v3263_v31 = vcombine.high %v4129_v26, %v794_v17  ;;  %v651_v49 = vsel %vm613_vm3, %v625_v60, %v600_v36  ;;  %v628_v32 = vsel %vm613_vm3, %v600_v36, %v4333_v21  ;;  %v626_v9 = vsel %vm613_vm3, %v4140_v34, %v625_v60 }
 0x13e   : > { %3312 = vmatprep.subr.msk.bf16.mxu0 %vm224_vm0, %v3293_v18  ;;  %v4354_v57 = vcombine.high %v651_v49, %v628_v32  ;;  %v554_v26 = vsel %vm224_vm0, %v528_v44, %v553_v12  ;;  %v3231_v45 = vcombine.high %v650_v14, %v626_v9  ;;  %v4359_v53 = vcombine.low %v651_v49, %v628_v32  ;;  %v196_v49 = vld [vmem:[%s3673_s8 + $0x40] sm:$0xff] }
 0x13f   : > { %2443 = vmatpush2.bf16.msra.mxu1 %v2138_v62  ;;  %v3230_v34 = vcombine.low %v650_v14, %v626_v9  ;;  %v409_v30 = vrot.slane %v408_v54, 4  ;;  %v3217_v39 = vcombine.high %v530_v15, %v626_v9  ;;  %v384_v18 = vrot.slane %v383_v10, 4 }
 0x140   : > { %2444 = vmatprep.subr.bf16.mxu1 %v4328_v48  ;;  %v3216_v1 = vcombine.low %v530_v15, %v626_v9  ;;  %v3187_v17 = vcombine.high %v4199_v40, %v508_v11  ;;  %v3202_v56 = vcombine.low %v530_v15, %v540_v27 }
 0x141   : > { %2390 = vmatpush2.bf16.msra.mxu0 %v2132_v7  ;;  %v410_v36 = vsel %vm224_vm0, %v384_v18, %v409_v30  ;;  %v385_v23 = vsel %vm224_vm0, %v323_v3, %v384_v18  ;;  %v364_v7 = vsel %vm325_vm4, %v4223_v50, %v4204_v33  ;;  %v197_v50 = vld [vmem:[%s3673_s8 + $0x48] sm:$0xff] }
 0x142   : > { %2391 = vmatprep.subr.bf16.mxu0 %v3263_v31  ;;  %v396_v52 = vsel %vm325_vm4, %v385_v23, %v383_v10  ;;  %v411_v62 = vsel %vm325_vm4, %v383_v10, %v410_v36  ;;  %v3138_v61 = vcombine.low %v197_v50, %v4240_v51 }
 0x143   : > { %2445 = vmatpush2.bf16.msra.mxu1 %v4338_v24  ;;  %v3171_v3 = vcombine.high %v396_v52, %v411_v62 }
 0x144   : > { %2446 = vmatprep.subr.bf16.mxu1 %v3263_v31  ;;  %v386_v31 = vsel %vm325_vm4, %v4204_v33, %v385_v23  ;;  %v3170_v33 = vcombine.low %v396_v52, %v411_v62 }
 0x145   : > { %2392 = vmatpush2.bf16.msra.mxu0 %v3262_v8  ;;  %v3155_v60 = vcombine.high %v364_v7, %v386_v31  ;;  %v3154_v63 = vcombine.low %v364_v7, %v386_v31 }
 0x146   : > { %2393 = vmatprep.subr.bf16.mxu0 %v4154_v4  ;;  %v555_v4 = vsel %vm469_vm2, %v527_v41, %v554_v26  ;;  %v223_v41 = vrot.slane %v196_v49, 4  ;;  %v3137_v26 = vcombine.high %v196_v49, %v4244_v29 }
 0x147   : > { %2447 = vmatpush2.bf16.msra.mxu1 %v3262_v8  ;;  %v3218_v55 = vcombine.low %v555_v4, %v628_v32  ;;  %v815_v8 = vpop.permute.xlu0 %814 }
 0x148   : > { %2448 = vmatprep.subr.bf16.mxu1 %v4354_v57  ;;  %v232_v14 = vsel %vm224_vm0, %v222_v20, %v223_v41  ;;  %v816_v44 = vrot.slane %v815_v8, 4 }
 0x149   : > { %2394 = vmatpush2.bf16.msra.mxu0 %v4167_v16  ;;  %v3219_v16 = vcombine.high %v555_v4, %v628_v32  ;;  %v840_v32 = vpop.permute.xlu1 %839 }
 0x14a   : > { %2395 = vmatprep.subr.bf16.mxu0 %v3231_v45  ;;  %v841_v9 = vrot.slane %v840_v32, 4 }
 0x14b   : > { %2449 = vmatpush2.bf16.msra.mxu1 %v4359_v53  ;;  %v671_v30 = vpop.permute.xlu0 %670 }
 0x14c   : > { %2450 = vmatprep.subr.bf16.mxu1 %v3231_v45  ;;  %v672_v18 = vrot.slane %v671_v30, 4 }
 0x14d   : > { %2396 = vmatpush2.bf16.msra.mxu0 %v3230_v34 }
 0x14e   : > { %2397 = vmatprep.subr.bf16.mxu0 %v4180_v46  ;;  %v3203_v46 = vcombine.high %v530_v15, %v540_v27  ;;  %v3136_v15 = vcombine.low %v196_v49, %v4244_v29  ;;  %v696_v27 = vpop.permute.xlu1 %695 }
 0x14f   : > { %2451 = vmatpush2.bf16.msra.mxu1 %v3230_v34  ;;  %v842_v34 = vsel %vm224_vm0, %v816_v44, %v841_v9 }
 0x150   : > { %2526 = vmatprep.subr.bf16.mxu1 %v3219_v16  ;;  %v843_v20 = vsel %vm757_vm5, %v815_v8, %v842_v34 }
 0x151   : > { %2398 = vmatpush2.bf16.msra.mxu0 %v4191_v6  ;;  %v3186_v6 = vcombine.low %v4199_v40, %v508_v11  ;;  %v3458_v40 = vld [vmem:[%s4619_s1 + $0x4] ss:$8 sps:$4 sm:$0xff]   ;;  %v3298_v29 = vcombine.low %v843_v20, %v843_v20 }
 0x152   : > { %2473 = vmatprep.subr.bf16.mxu0 %v3217_v39  ;;  %2453 = vmatmul.mubr.bf16.vlgmr.msra.gmra.mxu1 %v4022_v38  ;;  %v697_v39 = vrot.slane %v696_v27, 4 }
 0x153   : > { %2527 = vmatpush1.bf16.msra.mxu1 %v3218_v55  ;;  %3317 = vmatprep.mubr.msk.bf16.mxu1 %vm2099_vm1, %v4034_v5  ;;  %v796_v55 = vsel %vm757_vm5, %v4292_v0, %v4269_v25 }
 0x154   : > { %2400 = vmatmul.mubr.bf16.vlgmr.msra.gmra.mxu0 %v4022_v38  ;;  %2528 = vmatprep.subr.bf16.mxu1 %v3203_v46  ;;  %v3266_v0 = vcombine.low %v4303_v35, %v796_v55 }
 0x155   : > { %2474 = vmatpush1.bf16.msra.mxu0 %v3216_v1  ;;  %3314 = vmatprep.mubr.msk.bf16.mxu0 %vm2099_vm1, %v4034_v5  ;;  %v698_v1 = vsel %vm224_vm0, %v672_v18, %v697_v39 }
 0x156   : > { %2475 = vmatprep.subr.bf16.mxu0 %v3187_v17  ;;  %v699_v23 = vsel %vm613_vm3, %v671_v30, %v698_v1 }
 0x157   : > { %2529 = vmatpush1.bf16.msra.mxu1 %v3202_v56 }
 0x158   : > { %2530 = vmatprep.subr.bf16.mxu1 %v3187_v17  ;;  %v3267_v17 = vcombine.high %v4303_v35, %v796_v55 }
 0x159   : > { %2476 = vmatpush1.bf16.msra.mxu0 %v3186_v6 }
 0x15a   : > { %2477 = vmatprep.subr.bf16.mxu0 %v4216_v43  ;;  %2463 = vmatmul.mubr.bf16.gmra.mxu1 %v4059_v19  ;;  %v258_v43 = vrot.slane %v197_v50, 4 }
 0x15b   : > { %2531 = vmatpush1.bf16.msra.mxu1 %v3186_v6  ;;  %3322 = vmatprep.mubr.msk.bf16.mxu1 %vm2099_vm1, %v3458_v40  ;;  %v652_v6 = vsel %vm613_vm3, %v4333_v21, %v4314_v58 }
 0x15c   : > { %2532 = vmatprep.subr.bf16.mxu1 %v3171_v3  ;;  %2410 = vmatmul.mubr.bf16.gmra.mxu0 %v4059_v19  ;;  %v259_v12 = vsel %vm224_vm0, %v223_v41, %v258_v43  ;;  %v4462_v3 = vpop.permute.xlu1 %1068 }
 0x15d   : > { %2478 = vmatpush1.bf16.msra.mxu0 %v4228_v47  ;;  %3319 = vmatprep.mubr.msk.bf16.mxu0 %vm2099_vm1, %v3458_v40  ;;  %v3139_v47 = vcombine.high %v197_v50, %v4240_v51  ;;  %v3123_v45 = vcombine.high %v196_v49, %v259_v12  ;;  %v3122_v13 = vcombine.low %v196_v49, %v259_v12 }
 0x15e   : > { %2479 = vmatprep.subr.bf16.mxu0 %v3155_v60  ;;  %v3299_v51 = vcombine.high %v843_v20, %v843_v20 }
 0x15f   : > { %2533 = vmatpush1.bf16.msra.mxu1 %v3170_v33 }
 0x160   : > { %2534 = vmatprep.subr.bf16.mxu1 %v3155_v60  ;;  %v4468_v12 = vpop.permute.xlu1 %1073 }
 0x161   : > { %2480 = vmatpush1.bf16.msra.mxu0 %v3154_v63 }
 0x162   : > { %2481 = vmatprep.subr.bf16.mxu0 %v4251_v37  ;;  %v3459_v37 = vld [vmem:[%s3673_s8 + $0x38] sm:$0xff]  ;;  %s3087_s8 = sshll.u32 %s3669_s28, 8 }
 0x163   : > { %2535 = vmatpush1.bf16.msra.mxu1 %v3154_v63  ;;  %v3107_v4 = vcombine.high %v3459_v37, %v232_v14  ;;  %v3106_v54 = vcombine.low %v3459_v37, %v232_v14  ;;  %s4472_s10 = scalar_lea.vmem [#allocation6], %s3087_s8 }
 0x164   : > { %2536 = vmatprep.subr.bf16.mxu1 %v3139_v47  ;;  %s3009_s17 = sshll.u32 %s4472_s10, 4  ;;  %s4573_s17 = int_to_ptr.vmem [resolvable:$true] %s3009_s17 }
 0x165   : > { %2482 = vmatpush1.bf16.msra.mxu0 %v4261_v59  ;;  %v817_v59 = vsel %vm224_vm0, %v755_v42, %v816_v44  ;;  %s3488_s26 = scalar_lea.vmem %s4573_s17, 4096  ;;  %p3495_p1 = scmp.lt.s32.totalorder %s4573_s17, %s3493_s29 }
 0x166   : > { %2483 = vmatprep.subr.bf16.mxu0 %v3137_v26  ;;  %v818_v16 = vsel %vm757_vm5, %v4269_v25, %v817_v59  ;;  %v828_v10 = vsel %vm757_vm5, %v817_v59, %v815_v8  ;;  %v673_v25 = vsel %vm224_vm0, %v611_v28, %v672_v18  ;;  %p3489_p11 = scmp.ne.s32.totalorder %s4573_s17, %s3488_s26  ;;  %p3496_p3 = scmp.lt.s32.totalorder %s3494_s5, %s3488_s26 }
 0x167   : > { %2537 = vmatpush1.bf16.msra.mxu1 %v3138_v61  ;;  %v3297_v11 = vcombine.high %v818_v16, %v818_v16  ;;  %v3296_v42 = vcombine.low %v818_v16, %v818_v16  ;;  %v3283_v46 = vcombine.high %v818_v16, %v828_v10  ;;  %v3282_v56 = vcombine.low %v818_v16, %v828_v10 }
 0x168   : > { %2538 = vmatprep.subr.bf16.mxu1 %v3123_v45  ;;  %v674_v52 = vsel %vm613_vm3, %v4314_v58, %v673_v25  ;;  %v4457_v58 = vpop.permute.xlu0 %1063  ;;  %p3490_p13 = pnand %p3489_p11, %p4631_p12  ;;  %p3497_p8 = por %p3496_p3, %p3495_p1 }
 0x169   : > { %2484 = vmatpush1.bf16.msra.mxu0 %v3136_v15  ;;  %v2144_v36 = vsel %vm224_vm0, %v3296_v42, 0  ;;  %v3235_v62 = vcombine.high %v652_v6, %v674_v52  ;;  %v3234_v7 = vcombine.low %v652_v6, %v674_v52 }
 0x16a   : > { %2485 = vmatprep.subr.bf16.mxu0 %v3107_v4  ;;  %p3491_p0 = pneg %p3490_p13 }
 0x16b   : > { %2539 = vmatpush1.bf16.msra.mxu1 %v3122_v13 }
 0x16c   : > { %2540 = vmatprep.subr.bf16.mxu1 %v3107_v4  ;;  %v4482_v42 = vpop.permute.xlu0 %1078  ;;  %p3498_p10 = pnand %p3497_p8, %p3491_p0 }
 0x16d   : > { %2486 = vmatpush1.bf16.msra.mxu0 %v3106_v54 }
 0x16e   : > { %2487 = vmatprep.subr.bf16.mxu0 %v4284_v2  ;;  %v2150_v2 = vsel %vm224_vm0, %v3298_v29, 0 }
 0x16f   : > { %2541 = vmatpush1.bf16.msra.mxu1 %v3106_v54 }
 0x170   : > { %3321 = vmatprep.subr.msk.bf16.mxu1 %vm224_vm0, %v3299_v51 }
 0x171   : > { %2488 = vmatpush1.bf16.msra.mxu0 %v4298_v22  ;;  %v684_v22 = vsel %vm613_vm3, %v673_v25, %v671_v30 }
 0x172   : > { %3318 = vmatprep.subr.msk.bf16.mxu0 %vm224_vm0, %v3297_v11  ;;  %v3251_v28 = vcombine.high %v684_v22, %v699_v23  ;;  %v3250_v35 = vcombine.low %v684_v22, %v699_v23 }
 0x173   : > { %2549 = vmatpush2.bf16.msra.mxu1 %v2150_v2 }
 0x174   : > { %2550 = vmatprep.subr.bf16.mxu1 %v3283_v46 }
 0x175   : > { %2496 = vmatpush2.bf16.msra.mxu0 %v2144_v36 }
 0x176   : > { %2497 = vmatprep.subr.bf16.mxu0 %v3267_v17 }
 0x177   : > { %2551 = vmatpush2.bf16.msra.mxu1 %v3282_v56 }
 0x178   : > { %2552 = vmatprep.subr.bf16.mxu1 %v3267_v17 }
 0x179   : > { %2498 = vmatpush2.bf16.msra.mxu0 %v3266_v0 }
 0x17a   : > { %2499 = vmatprep.subr.bf16.mxu0 %v4328_v48 }
 0x17b   : > { %2553 = vmatpush2.bf16.msra.mxu1 %v3266_v0 }
 0x17c   : > { %2554 = vmatprep.subr.bf16.mxu1 %v3251_v28 }
 0x17d   : > { %2500 = vmatpush2.bf16.msra.mxu0 %v4338_v24 }
 0x17e   : > { %2501 = vmatprep.subr.bf16.mxu0 %v3235_v62 }
 0x17f   : > { %2555 = vmatpush2.bf16.msra.mxu1 %v3250_v35 }
 0x180   : > { %2556 = vmatprep.subr.bf16.mxu1 %v3235_v62 }
 0x181   : > { %2502 = vmatpush2.bf16.msra.mxu0 %v3234_v7 }
 0x182   : > { %2503 = vmatprep.subr.bf16.mxu0 %v4354_v57 }
 0x183   : > { %2557 = vmatpush2.bf16.msra.mxu1 %v3234_v7 }
 0x185   : > { %2504 = vmatpush2.bf16.msra.mxu0 %v4359_v53 }
 0x186   : > { %2559 = vmatmul.mubr.bf16.vlgmr.msra.gmra.mxu1 %v4022_v38 }
 0x187   : > { %3323 = vmatprep.mubr.msk.bf16.mxu1 %vm2099_vm1, %v4034_v5 }
 0x188   : > { %2506 = vmatmul.mubr.bf16.vlgmr.msra.gmra.mxu0 %v4022_v38 }
 0x189   : > { %3320 = vmatprep.mubr.msk.bf16.mxu0 %vm2099_vm1, %v4034_v5 }
 0x18e   : > { %2569 = vmatmul.mubr.bf16.gmra.mxu1 %v4059_v19 }
 0x190   : > { %2516 = vmatmul.mubr.bf16.gmra.mxu0 %v4059_v19 }
 0x1aa   : > { %v2242_v48 = vpop.f32.mrf.mxu1 }
 0x1ab   : > { %v2243_v21 = vadd.f32 %v2242_v48, %v4457_v58  ;;  %v2189_v24 = vpop.f32.mrf.mxu0 }
 0x1ac   : > { %v2244_v57 = vpop.f32.mrf.mxu1  ;;  %v2190_v53 = vadd.f32 %v2189_v24, %v4457_v58 }
 0x1ad   : > { %vm2581_vm6 = vcmp.ge.f32.partialorder %v2243_v21, 0.0  ;;  %v2645_v31 = vmul.f32 0.2, %v2243_v21  ;;  %v2245_v38 = vadd.f32 %v2244_v57, %v4457_v58  ;;  %v2191_v5 = vpop.f32.mrf.mxu0 }
 0x1ae   : > { %v2246_v40 = vpop.f32.mrf.mxu1  ;;  %vm2579_vm7 = vcmp.ge.f32.partialorder %v2190_v53, 0.0  ;;  %v2643_v60 = vmul.f32 0.2, %v2190_v53  ;;  %v2192_v19 = vadd.f32 %v2191_v5, %v4457_v58 }
 0x1af   : > { %v2709_v49 = vsel %vm2581_vm6, %v2243_v21, %v2645_v31  ;;  %vm2582_vm8 = vcmp.ge.f32.partialorder %v2245_v38, 0.0  ;;  %v2646_v50 = vmul.f32 0.2, %v2245_v38  ;;  %v2193_v33 = vpop.f32.mrf.mxu0  ;;  %v2247_v43 = vadd.f32 %v2246_v40, %v4462_v3 }
 0x1b0   : > { %v2248_v41 = vpop.f32.mrf.mxu1  ;;  %v2707_v63 = vsel %vm2579_vm7, %v2190_v53, %v2643_v60  ;;  %vm2580_vm9 = vcmp.ge.f32.partialorder %v2192_v19, 0.0  ;;  %v2644_v8 = vmul.f32 0.2, %v2192_v19  ;;  %v2194_v32 = vadd.f32 %v2193_v33, %v4462_v3 }
 0x1b1   : > { %v2710_v9 = vsel %vm2582_vm8, %v2245_v38, %v2646_v50  ;;  %vm2597_vm10 = vcmp.ge.f32.partialorder %v2247_v43, 0.0  ;;  %v2661_v47 = vmul.f32 0.2, %v2247_v43  ;;  %v2195_v14 = vpop.f32.mrf.mxu0  ;;  %v2249_v44 = vadd.f32 %v2248_v41, %v4462_v3 }
 0x1b2   : > { %v2252_v26 = vpop.f32.mrf.mxu1  ;;  %v2708_v45 = vsel %vm2580_vm9, %v2192_v19, %v2644_v8  ;;  %v3362_v61 = vpack.c.bf16 %v2710_v9, %v2709_v49  ;;  %vm2595_vm11 = vcmp.ge.f32.partialorder %v2194_v32, 0.0  ;;  %v2659_v34 = vmul.f32 0.2, %v2194_v32 }
 0x1b3   : > { %v3361_v37 = vpack.c.bf16 %v2708_v45, %v2707_v63  ;;  %v2196_v4 = vadd.f32 %v2195_v14, %v4462_v3  ;;  %vm2598_vm12 = vcmp.ge.f32.partialorder %v2249_v44, 0.0  ;;  %v2725_v20 = vsel %vm2597_vm10, %v2247_v43, %v2661_v47 }
 0x1b4   : > { %v2199_v15 = vpop.f32.mrf.mxu0  ;;  %v2254_v13 = vpop.f32.mrf.mxu1  ;;  %2964 = vst [vmem:[%s4472_s10 + $0x8] sm:$0xff] %v3362_v61  ;;  %v2662_v54 = vmul.f32 0.2, %v2249_v44  ;;  %v2253_v51 = vadd.f32 %v2252_v26, %v4468_v12  ;;  %v2723_v16 = vsel %vm2595_vm11, %v2194_v32, %v2659_v34 }
 0x1b5   : > { %v2200_v59 = vadd.f32 %v2199_v15, %v4468_v12  ;;  %2963 = vst [vmem:[%s4472_s10] sm:$0xff] %v3361_v37  ;;  %vm2596_vm13 = vcmp.ge.f32.partialorder %v2196_v4, 0.0  ;;  %v2660_v27 = vmul.f32 0.2, %v2196_v4  ;;  %v2255_v30 = vadd.f32 %v2254_v13, %v4468_v12 }
 0x1b6   : > { %v2201_v29 = vpop.f32.mrf.mxu0  ;;  %v2256_v10 = vpop.f32.mrf.mxu1  ;;  %v2726_v39 = vsel %vm2598_vm12, %v2249_v44, %v2662_v54  ;;  %vm2613_vm15 = vcmp.ge.f32.partialorder %v2253_v51, 0.0  ;;  %v2677_v56 = vmul.f32 0.2, %v2253_v51 }
 0x1b7   : > { %v2202_v11 = vadd.f32 %v2201_v29, %v4468_v12  ;;  %vm2611_vm14 = vcmp.ge.f32.partialorder %v2200_v59, 0.0  ;;  %v2724_v55 = vsel %vm2596_vm13, %v2196_v4, %v2660_v27  ;;  %v3370_v18 = vpack.c.bf16 %v2726_v39, %v2725_v20 }
 0x1b8   : > { %v2203_v2 = vpop.f32.mrf.mxu0  ;;  %vm2614_vm0 = vcmp.ge.f32.partialorder %v2255_v30, 0.0  ;;  %v2675_v46 = vmul.f32 0.2, %v2200_v59  ;;  %v2258_v1 = vpop.f32.mrf.mxu1  ;;  %v3369_v36 = vpack.c.bf16 %v2724_v55, %v2723_v16  ;;  %v2678_v25 = vmul.f32 0.2, %v2255_v30 }
 0x1b9   : > { %vm2612_vm1 = vcmp.ge.f32.partialorder %v2202_v11, 0.0  ;;  %v2676_v17 = vmul.f32 0.2, %v2202_v11  ;;  %2972 = vst [vmem:[%s4472_s10 + $0x48] sm:$0xff] %v3370_v18  ;;  %v2204_v22 = vadd.f32 %v2203_v2, %v4482_v42  ;;  %v2257_v6 = vadd.f32 %v2256_v10, %v4482_v42 }
 0x1ba   : > { %v2739_v0 = vsel %vm2611_vm14, %v2200_v59, %v2675_v46  ;;  %v2205_v23 = vpop.f32.mrf.mxu0  ;;  %2971 = vst [vmem:[%s4472_s10 + $0x40] sm:$0xff] %v3369_v36  ;;  %v2741_v28 = vsel %vm2613_vm15, %v2253_v51, %v2677_v56  ;;  %v2259_v35 = vadd.f32 %v2258_v1, %v4482_v42  ;;  %v2742_v7 = vsel %vm2614_vm0, %v2255_v30, %v2678_v25 }
 0x1bb   : > { %v2740_v52 = vsel %vm2612_vm1, %v2202_v11, %v2676_v17  ;;  %v2206_v62 = vadd.f32 %v2205_v23, %v4482_v42  ;;  %vm2627_vm2 = vcmp.ge.f32.partialorder %v2204_v22, 0.0  ;;  %v2691_v21 = vmul.f32 0.2, %v2204_v22 }
 0x1bc   : > { %v3377_v48 = vpack.c.bf16 %v2740_v52, %v2739_v0  ;;  %v3378_v24 = vpack.c.bf16 %v2742_v7, %v2741_v28  ;;  %vm2629_vm4 = vcmp.ge.f32.partialorder %v2257_v6, 0.0  ;;  %vm2630_vm5 = vcmp.ge.f32.partialorder %v2259_v35, 0.0 }
 0x1bd   : > { %vm2628_vm3 = vcmp.ge.f32.partialorder %v2206_v62, 0.0  ;;  %v2692_v57 = vmul.f32 0.2, %v2206_v62  ;;  %v2755_v53 = vsel %vm2627_vm2, %v2204_v22, %v2691_v21  ;;  %v2693_v31 = vmul.f32 0.2, %v2257_v6 }
 0x1be   : > { %2979 = vst [vmem:[%s4472_s10 + $0x80] sm:$0xff] %v3377_v48  ;;  %v2694_v38 = vmul.f32 0.2, %v2259_v35  ;;  %2980 = vst [vmem:[%s4472_s10 + $0x88] sm:$0xff] %v3378_v24 }
 0x1bf   : > { %v2756_v5 = vsel %vm2628_vm3, %v2206_v62, %v2692_v57  ;;  %v2757_v60 = vsel %vm2629_vm4, %v2257_v6, %v2693_v31 }
 0x1c0   : > { %v3385_v40 = vpack.c.bf16 %v2756_v5, %v2755_v53  ;;  %v2758_v19 = vsel %vm2630_vm5, %v2259_v35, %v2694_v38 }
 0x1c1   : > { %v3386_v49 = vpack.c.bf16 %v2758_v19, %v2757_v60 }
 0x1c2   : > { %2987 = vst [vmem:[%s4472_s10 + $0xc0] sm:$0xff] %v3385_v40 }
 0x1c3   : > { %2988 = vst [vmem:[%s4472_s10 + $0xc8] sm:$0xff] %v3386_v49 }
 0x1de   : > { %v2348_v50 = vpop.f32.mrf.mxu1 }
 0x1df   : > { %v2349_v33 = vadd.f32 %v2348_v50, %v4457_v58 }
 0x1e0   : > { %v2295_v43 = vpop.f32.mrf.mxu0  ;;  %v2350_v41 = vpop.f32.mrf.mxu1 }
 0x1e1   : > { %v2296_v63 = vadd.f32 %v2295_v43, %v4457_v58  ;;  %vm2585_vm6 = vcmp.ge.f32.partialorder %v2349_v33, 0.0  ;;  %v2649_v8 = vmul.f32 0.2, %v2349_v33  ;;  %v2351_v32 = vadd.f32 %v2350_v41, %v4457_v58 }
 0x1e2   : > { %v2297_v9 = vpop.f32.mrf.mxu0  ;;  %v2352_v47 = vpop.f32.mrf.mxu1 }
 0x1e3   : > { %vm2583_vm7 = vcmp.ge.f32.partialorder %v2296_v63, 0.0  ;;  %v2647_v14 = vmul.f32 0.2, %v2296_v63  ;;  %v2298_v44 = vadd.f32 %v2297_v9, %v4457_v58  ;;  %v2713_v26 = vsel %vm2585_vm6, %v2349_v33, %v2649_v8 }
 0x1e4   : > { %vm2586_vm8 = vcmp.ge.f32.partialorder %v2351_v32, 0.0  ;;  %v2650_v45 = vmul.f32 0.2, %v2351_v32  ;;  %v2299_v61 = vpop.f32.mrf.mxu0  ;;  %v2353_v34 = vadd.f32 %v2352_v47, %v4462_v3  ;;  %v2354_v37 = vpop.f32.mrf.mxu1 }
 0x1e5   : > { %v2711_v4 = vsel %vm2583_vm7, %v2296_v63, %v2647_v14  ;;  %vm2584_vm9 = vcmp.ge.f32.partialorder %v2298_v44, 0.0  ;;  %v2648_v15 = vmul.f32 0.2, %v2298_v44  ;;  %v2300_v13 = vadd.f32 %v2299_v61, %v4462_v3 }
 0x1e6   : > { %v2714_v20 = vsel %vm2586_vm8, %v2351_v32, %v2650_v45  ;;  %vm2601_vm10 = vcmp.ge.f32.partialorder %v2353_v34, 0.0  ;;  %v2665_v54 = vmul.f32 0.2, %v2353_v34  ;;  %v2301_v59 = vpop.f32.mrf.mxu0  ;;  %v2355_v51 = vadd.f32 %v2354_v37, %v4462_v3  ;;  %v2358_v16 = vpop.f32.mrf.mxu1 }
 0x1e7   : > { %v2712_v27 = vsel %vm2584_vm9, %v2298_v44, %v2648_v15  ;;  %v3364_v29 = vpack.c.bf16 %v2714_v20, %v2713_v26  ;;  %vm2599_vm11 = vcmp.ge.f32.partialorder %v2300_v13, 0.0  ;;  %v2663_v10 = vmul.f32 0.2, %v2300_v13 }
 0x1e8   : > { %v3363_v30 = vpack.c.bf16 %v2712_v27, %v2711_v4  ;;  %v2302_v39 = vadd.f32 %v2301_v59, %v4462_v3  ;;  %vm2602_vm12 = vcmp.ge.f32.partialorder %v2355_v51, 0.0  ;;  %v2305_v11 = vpop.f32.mrf.mxu0  ;;  %v2360_v55 = vpop.f32.mrf.mxu1  ;;  %v2729_v18 = vsel %vm2601_vm10, %v2353_v34, %v2665_v54 }
 0x1e9   : > { %2966 = vst [vmem:[%s4472_s10 + $0x18] sm:$0xff] %v3364_v29  ;;  %v2666_v2 = vmul.f32 0.2, %v2355_v51  ;;  %v2306_v46 = vadd.f32 %v2305_v11, %v4468_v12  ;;  %v2359_v1 = vadd.f32 %v2358_v16, %v4468_v12  ;;  %v2727_v36 = vsel %vm2599_vm11, %v2300_v13, %v2663_v10 }
 0x1ea   : > { %2965 = vst [vmem:[%s4472_s10 + $0x10] sm:$0xff] %v3363_v30  ;;  %vm2600_vm13 = vcmp.ge.f32.partialorder %v2302_v39, 0.0  ;;  %v2664_v17 = vmul.f32 0.2, %v2302_v39  ;;  %v2307_v56 = vpop.f32.mrf.mxu0  ;;  %v2361_v25 = vadd.f32 %v2360_v55, %v4468_v12  ;;  %v2362_v0 = vpop.f32.mrf.mxu1 }
 0x1eb   : > { %v2730_v22 = vsel %vm2602_vm12, %v2355_v51, %v2666_v2  ;;  %vm2615_vm14 = vcmp.ge.f32.partialorder %v2306_v46, 0.0  ;;  %v2679_v23 = vmul.f32 0.2, %v2306_v46  ;;  %vm2617_vm15 = vcmp.ge.f32.partialorder %v2359_v1, 0.0 }
 0x1ec   : > { %v2728_v6 = vsel %vm2600_vm13, %v2302_v39, %v2664_v17  ;;  %v3372_v52 = vpack.c.bf16 %v2730_v22, %v2729_v18  ;;  %v2681_v28 = vmul.f32 0.2, %v2359_v1  ;;  %v2308_v62 = vadd.f32 %v2307_v56, %v4468_v12  ;;  %v2309_v35 = vpop.f32.mrf.mxu0  ;;  %v2364_v7 = vpop.f32.mrf.mxu1 }
 0x1ed   : > { %v3371_v48 = vpack.c.bf16 %v2728_v6, %v2727_v36  ;;  %v2743_v21 = vsel %vm2615_vm14, %v2306_v46, %v2679_v23  ;;  %vm2618_vm0 = vcmp.ge.f32.partialorder %v2361_v25, 0.0  ;;  %v2682_v24 = vmul.f32 0.2, %v2361_v25 }
 0x1ee   : > { %2974 = vst [vmem:[%s4472_s10 + $0x58] sm:$0xff] %v3372_v52  ;;  %v2745_v57 = vsel %vm2617_vm15, %v2359_v1, %v2681_v28  ;;  %vm2616_vm1 = vcmp.ge.f32.partialorder %v2308_v62, 0.0  ;;  %v2680_v53 = vmul.f32 0.2, %v2308_v62  ;;  %v2310_v31 = vadd.f32 %v2309_v35, %v4482_v42  ;;  %v2311_v38 = vpop.f32.mrf.mxu0 }
 0x1ef   : > { %2973 = vst [vmem:[%s4472_s10 + $0x50] sm:$0xff] %v3371_v48  ;;  %v2746_v5 = vsel %vm2618_vm0, %v2361_v25, %v2682_v24  ;;  %v2363_v40 = vadd.f32 %v2362_v0, %v4482_v42  ;;  %v2312_v60 = vadd.f32 %v2311_v38, %v4482_v42  ;;  %v2365_v19 = vadd.f32 %v2364_v7, %v4482_v42 }
 0x1f0   : > { %v2744_v49 = vsel %vm2616_vm1, %v2308_v62, %v2680_v53  ;;  %v3380_v50 = vpack.c.bf16 %v2746_v5, %v2745_v57  ;;  %vm2631_vm2 = vcmp.ge.f32.partialorder %v2310_v31, 0.0  ;;  %v2695_v33 = vmul.f32 0.2, %v2310_v31 }
 0x1f1   : > { %v3379_v43 = vpack.c.bf16 %v2744_v49, %v2743_v21  ;;  %vm2633_vm3 = vcmp.ge.f32.partialorder %v2363_v40, 0.0  ;;  %v2697_v41 = vmul.f32 0.2, %v2363_v40  ;;  %vm2632_vm4 = vcmp.ge.f32.partialorder %v2312_v60, 0.0 }
 0x1f2   : > { %2982 = vst [vmem:[%s4472_s10 + $0x98] sm:$0xff] %v3380_v50  ;;  %v2759_v63 = vsel %vm2631_vm2, %v2310_v31, %v2695_v33  ;;  %v2696_v8 = vmul.f32 0.2, %v2312_v60  ;;  %vm2634_vm5 = vcmp.ge.f32.partialorder %v2365_v19, 0.0  ;;  %v2698_v32 = vmul.f32 0.2, %v2365_v19 }
 0x1f3   : > { %2981 = vst [vmem:[%s4472_s10 + $0x90] sm:$0xff] %v3379_v43  ;;  %v2761_v9 = vsel %vm2633_vm3, %v2363_v40, %v2697_v41 }
 0x1f4   : > { %v2760_v47 = vsel %vm2632_vm4, %v2312_v60, %v2696_v8  ;;  %v2762_v14 = vsel %vm2634_vm5, %v2365_v19, %v2698_v32 }
 0x1f5   : > { %v3387_v44 = vpack.c.bf16 %v2760_v47, %v2759_v63  ;;  %v3388_v26 = vpack.c.bf16 %v2762_v14, %v2761_v9 }
 0x1f7   : > { %2989 = vst [vmem:[%s4472_s10 + $0xd0] sm:$0xff] %v3387_v44  ;;  %2990 = vst [vmem:[%s4472_s10 + $0xd8] sm:$0xff] %v3388_v26 }
 0x212   : > { %v2454_v45 = vpop.f32.mrf.mxu1 }
 0x213   : > { %v2455_v61 = vadd.f32 %v2454_v45, %v4457_v58 }
 0x214   : > { %v2401_v34 = vpop.f32.mrf.mxu0  ;;  %v2456_v37 = vpop.f32.mrf.mxu1 }
 0x215   : > { %v2402_v4 = vadd.f32 %v2401_v34, %v4457_v58  ;;  %vm2589_vm6 = vcmp.ge.f32.partialorder %v2455_v61, 0.0  ;;  %v2653_v15 = vmul.f32 0.2, %v2455_v61  ;;  %v2457_v13 = vadd.f32 %v2456_v37, %v4457_v58 }
 0x216   : > { %v2403_v20 = vpop.f32.mrf.mxu0  ;;  %v2458_v54 = vpop.f32.mrf.mxu1 }
 0x217   : > { %vm2587_vm7 = vcmp.ge.f32.partialorder %v2402_v4, 0.0  ;;  %v2651_v59 = vmul.f32 0.2, %v2402_v4  ;;  %v2404_v51 = vadd.f32 %v2403_v20, %v4457_v58  ;;  %v2717_v16 = vsel %vm2589_vm6, %v2455_v61, %v2653_v15 }
 0x218   : > { %vm2590_vm8 = vcmp.ge.f32.partialorder %v2457_v13, 0.0  ;;  %v2654_v27 = vmul.f32 0.2, %v2457_v13  ;;  %v2405_v29 = vpop.f32.mrf.mxu0  ;;  %v2459_v10 = vadd.f32 %v2458_v54, %v4462_v3  ;;  %v2460_v30 = vpop.f32.mrf.mxu1 }
 0x219   : > { %v2715_v39 = vsel %vm2587_vm7, %v2402_v4, %v2651_v59  ;;  %vm2588_vm9 = vcmp.ge.f32.partialorder %v2404_v51, 0.0  ;;  %v2652_v11 = vmul.f32 0.2, %v2404_v51  ;;  %v2406_v55 = vadd.f32 %v2405_v29, %v4462_v3 }
 0x21a   : > { %v2718_v18 = vsel %vm2590_vm8, %v2457_v13, %v2654_v27  ;;  %vm2605_vm10 = vcmp.ge.f32.partialorder %v2459_v10, 0.0  ;;  %v2669_v2 = vmul.f32 0.2, %v2459_v10  ;;  %v2407_v46 = vpop.f32.mrf.mxu0  ;;  %v2461_v1 = vadd.f32 %v2460_v30, %v4462_v3  ;;  %v2464_v36 = vpop.f32.mrf.mxu1 }
 0x21b   : > { %v2716_v17 = vsel %vm2588_vm9, %v2404_v51, %v2652_v11  ;;  %v3366_v56 = vpack.c.bf16 %v2718_v18, %v2717_v16  ;;  %vm2603_vm11 = vcmp.ge.f32.partialorder %v2406_v55, 0.0  ;;  %v2667_v25 = vmul.f32 0.2, %v2406_v55 }
 0x21c   : > { %v3365_v0 = vpack.c.bf16 %v2716_v17, %v2715_v39  ;;  %v2408_v22 = vadd.f32 %v2407_v46, %v4462_v3  ;;  %vm2606_vm12 = vcmp.ge.f32.partialorder %v2461_v1, 0.0  ;;  %v2411_v23 = vpop.f32.mrf.mxu0  ;;  %v2466_v6 = vpop.f32.mrf.mxu1  ;;  %v2733_v52 = vsel %vm2605_vm10, %v2459_v10, %v2669_v2 }
 0x21d   : > { %2968 = vst [vmem:[%s4472_s10 + $0x28] sm:$0xff] %v3366_v56  ;;  %v2670_v28 = vmul.f32 0.2, %v2461_v1  ;;  %v2412_v62 = vadd.f32 %v2411_v23, %v4468_v12  ;;  %v2465_v35 = vadd.f32 %v2464_v36, %v4468_v12  ;;  %v2731_v7 = vsel %vm2603_vm11, %v2406_v55, %v2667_v25 }
 0x21e   : > { %2967 = vst [vmem:[%s4472_s10 + $0x20] sm:$0xff] %v3365_v0  ;;  %vm2604_vm13 = vcmp.ge.f32.partialorder %v2408_v22, 0.0  ;;  %v2668_v48 = vmul.f32 0.2, %v2408_v22  ;;  %v2413_v21 = vpop.f32.mrf.mxu0  ;;  %v2467_v24 = vadd.f32 %v2466_v6, %v4468_v12  ;;  %v2468_v57 = vpop.f32.mrf.mxu1 }
 0x21f   : > { %v2734_v53 = vsel %vm2606_vm12, %v2461_v1, %v2670_v28  ;;  %vm2619_vm14 = vcmp.ge.f32.partialorder %v2412_v62, 0.0  ;;  %v2683_v31 = vmul.f32 0.2, %v2412_v62  ;;  %vm2621_vm15 = vcmp.ge.f32.partialorder %v2465_v35, 0.0 }
 0x220   : > { %v2732_v38 = vsel %vm2604_vm13, %v2408_v22, %v2668_v48  ;;  %v3374_v5 = vpack.c.bf16 %v2734_v53, %v2733_v52  ;;  %v2685_v40 = vmul.f32 0.2, %v2465_v35  ;;  %v2414_v60 = vadd.f32 %v2413_v21, %v4468_v12  ;;  %v2415_v19 = vpop.f32.mrf.mxu0  ;;  %v2470_v49 = vpop.f32.mrf.mxu1 }
 0x221   : > { %v3373_v50 = vpack.c.bf16 %v2732_v38, %v2731_v7  ;;  %v2747_v33 = vsel %vm2619_vm14, %v2412_v62, %v2683_v31  ;;  %vm2622_vm0 = vcmp.ge.f32.partialorder %v2467_v24, 0.0  ;;  %v2686_v43 = vmul.f32 0.2, %v2467_v24 }
 0x222   : > { %2976 = vst [vmem:[%s4472_s10 + $0x68] sm:$0xff] %v3374_v5  ;;  %v2749_v41 = vsel %vm2621_vm15, %v2465_v35, %v2685_v40  ;;  %vm2620_vm1 = vcmp.ge.f32.partialorder %v2414_v60, 0.0  ;;  %v2684_v63 = vmul.f32 0.2, %v2414_v60  ;;  %v2416_v8 = vadd.f32 %v2415_v19, %v4482_v42  ;;  %v2417_v32 = vpop.f32.mrf.mxu0 }
 0x223   : > { %2975 = vst [vmem:[%s4472_s10 + $0x60] sm:$0xff] %v3373_v50  ;;  %v2750_v9 = vsel %vm2622_vm0, %v2467_v24, %v2686_v43  ;;  %v2469_v47 = vadd.f32 %v2468_v57, %v4482_v42  ;;  %v2418_v14 = vadd.f32 %v2417_v32, %v4482_v42  ;;  %v2471_v44 = vadd.f32 %v2470_v49, %v4482_v42 }
 0x224   : > { %v2748_v26 = vsel %vm2620_vm1, %v2414_v60, %v2684_v63  ;;  %v3382_v45 = vpack.c.bf16 %v2750_v9, %v2749_v41  ;;  %vm2635_vm2 = vcmp.ge.f32.partialorder %v2416_v8, 0.0  ;;  %v2699_v61 = vmul.f32 0.2, %v2416_v8 }
 0x225   : > { %v3381_v34 = vpack.c.bf16 %v2748_v26, %v2747_v33  ;;  %vm2637_vm3 = vcmp.ge.f32.partialorder %v2469_v47, 0.0  ;;  %v2701_v37 = vmul.f32 0.2, %v2469_v47  ;;  %vm2636_vm4 = vcmp.ge.f32.partialorder %v2418_v14, 0.0 }
 0x226   : > { %2984 = vst [vmem:[%s4472_s10 + $0xa8] sm:$0xff] %v3382_v45  ;;  %v2763_v4 = vsel %vm2635_vm2, %v2416_v8, %v2699_v61  ;;  %v2700_v15 = vmul.f32 0.2, %v2418_v14  ;;  %vm2638_vm5 = vcmp.ge.f32.partialorder %v2471_v44, 0.0  ;;  %v2702_v13 = vmul.f32 0.2, %v2471_v44 }
 0x227   : > { %2983 = vst [vmem:[%s4472_s10 + $0xa0] sm:$0xff] %v3381_v34  ;;  %v2765_v20 = vsel %vm2637_vm3, %v2469_v47, %v2701_v37 }
 0x228   : > { %v2764_v54 = vsel %vm2636_vm4, %v2418_v14, %v2700_v15  ;;  %v2766_v59 = vsel %vm2638_vm5, %v2471_v44, %v2702_v13 }
 0x229   : > { %v3389_v51 = vpack.c.bf16 %v2764_v54, %v2763_v4  ;;  %v3390_v16 = vpack.c.bf16 %v2766_v59, %v2765_v20 }
 0x22b   : > { %2991 = vst [vmem:[%s4472_s10 + $0xe0] sm:$0xff] %v3389_v51  ;;  %2992 = vst [vmem:[%s4472_s10 + $0xe8] sm:$0xff] %v3390_v16 }
 0x246   : > { %v2560_v27 = vpop.f32.mrf.mxu1 }
 0x247   : > { %v2561_v29 = vadd.f32 %v2560_v27, %v4457_v58 }
 0x248   : > { %v2507_v10 = vpop.f32.mrf.mxu0  ;;  %v2562_v30 = vpop.f32.mrf.mxu1 }
 0x249   : > { %v2508_v39 = vadd.f32 %v2507_v10, %v4457_v58  ;;  %vm2593_vm6 = vcmp.ge.f32.partialorder %v2561_v29, 0.0  ;;  %v2657_v11 = vmul.f32 0.2, %v2561_v29  ;;  %v2563_v55 = vadd.f32 %v2562_v30, %v4457_v58 }
 0x24a   : > { %v2509_v18 = vpop.f32.mrf.mxu0  ;;  %v2564_v2 = vpop.f32.mrf.mxu1 }
 0x24b   : > { %vm2591_vm7 = vcmp.ge.f32.partialorder %v2508_v39, 0.0  ;;  %v2655_v46 = vmul.f32 0.2, %v2508_v39  ;;  %v2510_v1 = vadd.f32 %v2509_v18, %v4457_v58  ;;  %v2721_v36 = vsel %vm2593_vm6, %v2561_v29, %v2657_v11 }
 0x24c   : > { %vm2594_vm8 = vcmp.ge.f32.partialorder %v2563_v55, 0.0  ;;  %v2658_v17 = vmul.f32 0.2, %v2563_v55  ;;  %v2511_v56 = vpop.f32.mrf.mxu0  ;;  %v2565_v25 = vadd.f32 %v2564_v2, %v4462_v3  ;;  %v2566_v0 = vpop.f32.mrf.mxu1 }
 0x24d   : > { %v2719_v22 = vsel %vm2591_vm7, %v2508_v39, %v2655_v46  ;;  %vm2592_vm9 = vcmp.ge.f32.partialorder %v2510_v1, 0.0  ;;  %v2656_v23 = vmul.f32 0.2, %v2510_v1  ;;  %v2512_v6 = vadd.f32 %v2511_v56, %v4462_v3 }
 0x24e   : > { %v2722_v52 = vsel %vm2594_vm8, %v2563_v55, %v2658_v17  ;;  %vm2609_vm10 = vcmp.ge.f32.partialorder %v2565_v25, 0.0  ;;  %v2673_v28 = vmul.f32 0.2, %v2565_v25  ;;  %v2513_v62 = vpop.f32.mrf.mxu0  ;;  %v2567_v35 = vadd.f32 %v2566_v0, %v4462_v3  ;;  %v2570_v58 = vpop.f32.mrf.mxu1 }
 0x24f   : > { %v2720_v7 = vsel %vm2592_vm9, %v2510_v1, %v2656_v23  ;;  %v3368_v48 = vpack.c.bf16 %v2722_v52, %v2721_v36  ;;  %vm2607_vm11 = vcmp.ge.f32.partialorder %v2512_v6, 0.0  ;;  %v2671_v21 = vmul.f32 0.2, %v2512_v6 }
 0x250   : > { %v3367_v24 = vpack.c.bf16 %v2720_v7, %v2719_v22  ;;  %v2514_v57 = vadd.f32 %v2513_v62, %v4462_v3  ;;  %vm2610_vm12 = vcmp.ge.f32.partialorder %v2567_v35, 0.0  ;;  %v2517_v53 = vpop.f32.mrf.mxu0  ;;  %v2572_v31 = vpop.f32.mrf.mxu1  ;;  %v2737_v38 = vsel %vm2609_vm10, %v2565_v25, %v2673_v28 }
 0x251   : > { %2970 = vst [vmem:[%s4472_s10 + $0x38] sm:$0xff] %v3368_v48  ;;  %v2674_v5 = vmul.f32 0.2, %v2567_v35  ;;  %v2518_v40 = vadd.f32 %v2517_v53, %v4468_v12  ;;  %v2571_v60 = vadd.f32 %v2570_v58, %v4468_v12  ;;  %v2735_v19 = vsel %vm2607_vm11, %v2512_v6, %v2671_v21 }
 0x252   : > { %2969 = vst [vmem:[%s4472_s10 + $0x30] sm:$0xff] %v3367_v24  ;;  %vm2608_vm13 = vcmp.ge.f32.partialorder %v2514_v57, 0.0  ;;  %v2672_v49 = vmul.f32 0.2, %v2514_v57  ;;  %v2519_v50 = vpop.f32.mrf.mxu0  ;;  %v2573_v33 = vadd.f32 %v2572_v31, %v4468_v12  ;;  %v2574_v43 = vpop.f32.mrf.mxu1 }
 0x253   : > { %v2738_v3 = vsel %vm2610_vm12, %v2567_v35, %v2674_v5  ;;  %vm2623_vm14 = vcmp.ge.f32.partialorder %v2518_v40, 0.0  ;;  %v2687_v41 = vmul.f32 0.2, %v2518_v40  ;;  %vm2625_vm15 = vcmp.ge.f32.partialorder %v2571_v60, 0.0 }
 0x254   : > { %v2736_v63 = vsel %vm2608_vm13, %v2514_v57, %v2672_v49  ;;  %v3376_v8 = vpack.c.bf16 %v2738_v3, %v2737_v38  ;;  %v2689_v32 = vmul.f32 0.2, %v2571_v60  ;;  %v2520_v9 = vadd.f32 %v2519_v50, %v4468_v12  ;;  %v2521_v47 = vpop.f32.mrf.mxu0  ;;  %v2576_v14 = vpop.f32.mrf.mxu1 }
 0x255   : > { %v3375_v44 = vpack.c.bf16 %v2736_v63, %v2735_v19  ;;  %v2751_v26 = vsel %vm2623_vm14, %v2518_v40, %v2687_v41  ;;  %vm2626_vm0 = vcmp.ge.f32.partialorder %v2573_v33, 0.0  ;;  %v2690_v45 = vmul.f32 0.2, %v2573_v33 }
 0x256   : > { %2978 = vst [vmem:[%s4472_s10 + $0x78] sm:$0xff] %v3376_v8  ;;  %v2753_v61 = vsel %vm2625_vm15, %v2571_v60, %v2689_v32  ;;  %vm2624_vm1 = vcmp.ge.f32.partialorder %v2520_v9, 0.0  ;;  %v2688_v34 = vmul.f32 0.2, %v2520_v9  ;;  %v2522_v37 = vadd.f32 %v2521_v47, %v4482_v42  ;;  %v2523_v4 = vpop.f32.mrf.mxu0 }
 0x257   : > { %2977 = vst [vmem:[%s4472_s10 + $0x70] sm:$0xff] %v3375_v44  ;;  %v2754_v15 = vsel %vm2626_vm0, %v2573_v33, %v2690_v45  ;;  %v2575_v12 = vadd.f32 %v2574_v43, %v4482_v42  ;;  %v2524_v13 = vadd.f32 %v2523_v4, %v4482_v42  ;;  %v2577_v20 = vadd.f32 %v2576_v14, %v4482_v42 }
 0x258   : > { %v2752_v54 = vsel %vm2624_vm1, %v2520_v9, %v2688_v34  ;;  %v3384_v59 = vpack.c.bf16 %v2754_v15, %v2753_v61  ;;  %vm2639_vm2 = vcmp.ge.f32.partialorder %v2522_v37, 0.0  ;;  %v2703_v51 = vmul.f32 0.2, %v2522_v37 }
 0x259   : > { %v3383_v16 = vpack.c.bf16 %v2752_v54, %v2751_v26  ;;  %vm2641_vm3 = vcmp.ge.f32.partialorder %v2575_v12, 0.0  ;;  %v2705_v27 = vmul.f32 0.2, %v2575_v12  ;;  %vm2640_vm4 = vcmp.ge.f32.partialorder %v2524_v13, 0.0 }
 0x25a   : > { %2986 = vst [vmem:[%s4472_s10 + $0xb8] sm:$0xff] %v3384_v59  ;;  %v2704_v29 = vmul.f32 0.2, %v2524_v13  ;;  %vm2642_vm5 = vcmp.ge.f32.partialorder %v2577_v20, 0.0  ;;  %v2706_v10 = vmul.f32 0.2, %v2577_v20  ;;  %v2767_v42 = vsel %vm2639_vm2, %v2522_v37, %v2703_v51 }
 0x25b   : > { %2985 = vst [vmem:[%s4472_s10 + $0xb0] sm:$0xff] %v3383_v16  ;;  %v2769_v30 = vsel %vm2641_vm3, %v2575_v12, %v2705_v27 }
 0x25c   : > { %v2768_v39 = vsel %vm2640_vm4, %v2524_v13, %v2704_v29  ;;  %v2770_v11 = vsel %vm2642_vm5, %v2577_v20, %v2706_v10 }
 0x25d   : > { %v3391_v55 = vpack.c.bf16 %v2768_v39, %v2767_v42  ;;  %v3392_v18 = vpack.c.bf16 %v2770_v11, %v2769_v30 }
 0x25f   : > { %2993 = vst [vmem:[%s4472_s10 + $0xf0] sm:$0xff] %v3391_v55  ;;  %2994 = vst [vmem:[%s4472_s10 + $0xf8] sm:$0xff] %v3392_v18 }
 0x260   : > { %3501 = shalt.err (!%p3498_p10)
}
 0x261   : > { %s3502_s30 = scalar_lea.hbm %s4571_s25, 4096  ;;  %s3506_s6 = scalar_lea.hbm %s4621_s3, 8192 }
 0x262   : > { %p3503_p2 = scmp.ne.s32.totalorder %s4571_s25, %s3502_s30  ;;  %p3507_p7 = scmp.lt.s32.totalorder %s4571_s25, %s4621_s3 }
 0x263   : > { %p3508_p5 = scmp.lt.s32.totalorder %s3506_s6, %s3502_s30 }
 0x264   : > { %p3504_p4 = pnand %p3503_p2, %p4631_p12 }
 0x265   : > { %p3509_p6 = por %p3508_p5, %p3507_p7 }
 0x266   : > { %p3505_p9 = pneg %p3504_p4 }
 0x268   : > { %p3510_p11 = pnand %p3509_p6, %p3505_p9 }
 0x26a   : > { %3513 = shalt.err (!%p3510_p11)
}
 0x26b   : > { %s3561_s8 = smov 1024   ;;  %s3562_s10 = smov 64  }
 0x26c   : > { %3399 = dma.vmem_to_hbm [thread:$0]  (%p4631_p12), %s4573_s17, 4096, %s4571_s25, %s2996_s16, %s3561_s8, %s3561_s8, %s3562_s10  }
 0x26d PF: > { %s3024_s11 = sand.u32 1, %s3540_s12   ;;  %p4632_p13 = scmp.ne.s32.totalorder %s4626_s24, 0 }
 0x26e   : > { %p4633_p0 = scmp.ge.s32.totalorder %s3552_s15, 2  ;;  %s3025_s19 = scalar_lea.sflag [#allocation5], %s3024_s11 }
 0x270   : > { %p3406_p1 = pnand %p4633_p0, %p4632_p13 }
 0x272   : > { %p3407_p3 = pneg %p3406_p1 }
 0x274   : > { %3535 = dma.done.wait (%p3407_p3), %s3025_s19, 4096  }
 0x275   : > { %3537 = vsyncadd (%p3407_p3), %s3025_s19, 4294963200  ;;  %p16_p8 = scmp.ge.s32.totalorder %s3608_s18, 4   ;;  %s4634_s12 = smov %s3544_s13 }
 0x276   : > { %s4635_s13 = smov %s3548_s14  ;;  %s4636_s14 = smov %s3620_s21 }
 0x277   : > { %s4637_s15 = smov %s3608_s18  ;;  %18 = sbr.rel (!%p16_p8) target bundleno = 5 (0x5), region = 77 }
 0x27c   :  { %3030 = vsyncpa [#allocation4], 1 }
 0x27d   :  { %3032 = vsyncpa [#allocation4 + $0x1], 1 }
 0x27e   :  { %3033 = vsyncpa [#allocation5], 1 }
 0x27f   :  { %3035 = vsyncpa [#allocation5 + $0x1], 1 }

</bundles_post_ra>
